<compile_context>
chip_gen: v7x
topology: tpu7x:2x2x1
jax: 0.10.0
libtpu: 0.0.40
codegen_flags: <defaults>
</compile_context>

<pallas_src>
import functools
import numpy as np
import jax
import jax.numpy as jnp
from jax.experimental import pallas as pl
from jax.experimental.pallas import tpu as pltpu


# ---------------------------------------------------------------------------
# Pallas tiled matmul kernels
# ---------------------------------------------------------------------------
def _mm_single_kernel(a_ref, b_ref, o_ref, *, apply_relu):
    # Whole K in one tile: no accumulator scratch, no init/finalize branches.
    r = jnp.dot(a_ref[...], b_ref[...], preferred_element_type=jnp.float32)
    if apply_relu:
        r = jnp.maximum(r, 0.0)
    o_ref[...] = r


def _mm_reduce_kernel(a_ref, b_ref, o_ref, *, apply_relu):
    # K is the last ("arbitrary") grid axis; o_ref is resident across it, so
    # accumulate directly into the output block (no VMEM scratch).
    @pl.when(pl.program_id(2) == 0)
    def _():
        o_ref[...] = jnp.zeros_like(o_ref)

    o_ref[...] += jnp.dot(a_ref[...], b_ref[...],
                          preferred_element_type=jnp.float32)

    if apply_relu:
        @pl.when(pl.program_id(2) == pl.num_programs(2) - 1)
        def _():
            o_ref[...] = jnp.maximum(o_ref[...], 0.0)


def _round_up(x, m):
    return (x + m - 1) // m * m


def _pick_tile(dim_padded, preferred):
    """Largest multiple of 128 that is <= preferred and divides dim_padded."""
    t = min(dim_padded, max(128, preferred))
    t = (t // 128) * 128
    while dim_padded % t != 0:
        t -= 128
    return t


_SINGLE_K_MAX = 4096            # K tiles up to this size use the fast path
_VMEM_LIMIT = 32 * 1024 * 1024  # explicit scoped-VMEM limit (v5e default is 16 MiB)


def pallas_matmul(a, b, apply_relu=False):
    """C = relu?(A @ B).  bf16 MXU inputs, f32 accumulation/output."""
    M, K = a.shape
    K2, N = b.shape
    assert K == K2, (a.shape, b.shape)
    a = jnp.asarray(a, jnp.bfloat16)
    b = jnp.asarray(b, jnp.bfloat16)

    Mp = _round_up(M, 128)
    Np = _round_up(N, 128)
    # Split M in two when possible so the 'parallel' grid has extent >= 2
    # (keeps both TensorCores busy on v7x); cap at 256 rows per tile.
    tm = _pick_tile(Mp, min(256, max(128, Mp // 2)))
    tn = _pick_tile(Np, 512)

    K128 = _round_up(K, 128)
    single_k = K128 <= _SINGLE_K_MAX
    if single_k:
        tk = K128
        Kp = K128
    else:
        tk = 2048
        for cand in range(3072, 1023, -128):   # prefer a tk that divides K exactly
            if K128 % cand == 0:
                tk = cand
                break
        Kp = _round_up(K128, tk)

    a_p = jnp.pad(a, ((0, Mp - M), (0, Kp - K)))
    b_p = jnp.pad(b, ((0, Kp - K), (0, Np - N)))

    cost = pl.CostEstimate(
        flops=2 * M * K * N,
        transcendentals=0,
        bytes_accessed=(M * K + K * N) * 2 + M * N * 4)

    if single_k:
        kernel = functools.partial(_mm_single_kernel, apply_relu=apply_relu)
        out = pl.pallas_call(
            kernel,
            out_shape=jax.ShapeDtypeStruct((Mp, Np), jnp.float32),
            grid_spec=pltpu.PrefetchScalarGridSpec(
                num_scalar_prefetch=0,
                grid=(Mp // tm, Np // tn),
                in_specs=[pl.BlockSpec((tm, Kp), lambda i, j: (i, 0)),
                          pl.BlockSpec((Kp, tn), lambda i, j: (0, j))],
                out_specs=pl.BlockSpec((tm, tn), lambda i, j: (i, j))),
            compiler_params=pltpu.CompilerParams(
                dimension_semantics=("parallel", "parallel"),
                vmem_limit_bytes=_VMEM_LIMIT),
            cost_estimate=cost,
        )(a_p, b_p)
    else:
        kernel = functools.partial(_mm_reduce_kernel, apply_relu=apply_relu)
        out = pl.pallas_call(
            kernel,
            out_shape=jax.ShapeDtypeStruct((Mp, Np), jnp.float32),
            grid_spec=pltpu.PrefetchScalarGridSpec(
                num_scalar_prefetch=0,
                grid=(Mp // tm, Np // tn, Kp // tk),
                in_specs=[pl.BlockSpec((tm, tk), lambda i, j, k: (i, k)),
                          pl.BlockSpec((tk, tn), lambda i, j, k: (k, j))],
                out_specs=pl.BlockSpec((tm, tn), lambda i, j, k: (i, j))),
            compiler_params=pltpu.CompilerParams(
                dimension_semantics=("parallel", "parallel", "arbitrary"),
                vmem_limit_bytes=_VMEM_LIMIT),
            cost_estimate=cost,
        )(a_p, b_p)

    if Mp != M or Np != N:
        out = out[:M, :N]
    return out


# ---------------------------------------------------------------------------
# Convolutions (im2col glue in bf16 + Pallas GEMM)
# ---------------------------------------------------------------------------
def _im2col3(x_bf16):
    """3x3, stride 1, pad 1 im2col.  x: [B,H,W,C] -> [B*H*W, 9*C] (bf16)."""
    B, H, W, C = x_bf16.shape
    xp = jnp.pad(x_bf16, ((0, 0), (1, 1), (1, 1), (0, 0)))
    cols = [xp[:, ky:ky + H, kx:kx + W, :] for ky in range(3) for kx in range(3)]
    p = jnp.stack(cols, axis=3)                         # [B, H, W, 9, C]
    return p.reshape(B * H * W, 9 * C)


def conv2d_nhwc(x, w_oihw, apply_relu=False):
    """x: [B,H,W,Cin] NHWC; w: PyTorch layout [Cout, Cin, k, k], k in {1, 3}.
    3x3 convs use padding=1 / stride=1 (as in the module)."""
    Cout, Cin, k, _ = w_oihw.shape
    B, H, W, _ = x.shape
    x = x.astype(jnp.bfloat16)
    if k == 1:
        out = pallas_matmul(x.reshape(B * H * W, Cin),
                            w_oihw.reshape(Cout, Cin).T, apply_relu)
    else:
        assert k == 3
        cols = _im2col3(x)
        w_mat = jnp.transpose(w_oihw, (2, 3, 1, 0)).reshape(9 * Cin, Cout)
        out = pallas_matmul(cols, w_mat, apply_relu)
    return out.reshape(B, H, W, Cout)


# ---------------------------------------------------------------------------
# Spatial (resize / adaptive pool) as block-diagonal GEMMs, channels lane-dense
# ---------------------------------------------------------------------------
def _bilinear_matrix(n_in, n_out):
    """PyTorch F.interpolate(mode='bilinear', align_corners=False)."""
    M = np.zeros((n_out, n_in), dtype=np.float32)
    scale = n_in / n_out
    for i in range(n_out):
        src = max((i + 0.5) * scale - 0.5, 0.0)
        i0 = min(int(np.floor(src)), n_in - 1)
        i1 = min(i0 + 1, n_in - 1)
        w1 = src - i0
        M[i, i0] += 1.0 - w1
        M[i, i1] += w1
    return M


def _adaptive_avg_matrix(n_in, n_out):
    """PyTorch AdaptiveAvgPool2d (per axis)."""
    M = np.zeros((n_out, n_in), dtype=np.float32)
    for i in range(n_out):
        s = (i * n_in) // n_out
        e = -(-((i + 1) * n_in) // n_out)  # ceil
        M[i, s:e] = 1.0 / (e - s)
    return M


def _block_diag(m, batch):
    r, c = m.shape
    out = np.zeros((batch * r, batch * c), np.float32)
    for b in range(batch):
        out[b * r:(b + 1) * r, b * c:(b + 1) * c] = m
    return out


def _bilinear_upsample_matrix(in_hw, out_hw, batch):
    mh = _bilinear_matrix(in_hw[0], out_hw[0])
    mw = _bilinear_matrix(in_hw[1], out_hw[1])
    return _block_diag(np.kron(mh, mw), batch)


def _pool_upsample_matrix(in_hw, pool_hw, out_hw, batch):
    """Composed AdaptiveAvgPool -> bilinear-upsample spatial operator."""
    mh = _bilinear_matrix(pool_hw[0], out_hw[0]) @ _adaptive_avg_matrix(in_hw[0], pool_hw[0])
    mw = _bilinear_matrix(pool_hw[1], out_hw[1]) @ _adaptive_avg_matrix(in_hw[1], pool_hw[1])
    return _block_diag(np.kron(mh, mw), batch)


def apply_spatial(S_bd, x, out_hw):
    """S_bd: block-diag [B*Ho*Wo, B*Hi*Wi]; x: [B,Hi,Wi,C] -> [B,Ho,Wo,C]."""
    B, Hi, Wi, C = x.shape
    Ho, Wo = out_hw
    om = pallas_matmul(S_bd, x.reshape(B * Hi * Wi, C))
    return om.reshape(B, Ho, Wo, C)


# ---------------------------------------------------------------------------
# fuse_conv2 (1x1) + ConvTranspose2d(4, stride=2, pad=1) fused as one 3x3 conv
# producing the 4 sub-pixel output phases.
# ---------------------------------------------------------------------------
def _build_fused_deconv_weight(fuse2_w, deconv_w):
    """fuse2_w: [nc, C, 1, 1] (Conv2d); deconv_w: [nc, nc, 4, 4] (ConvTranspose2d,
    [Cin, Cout, k, k]).  Returns a conv weight [4*nc, C, 3, 3] whose output
    channel block ph = 2*py + px holds output phase (2m+py, 2n+px)."""
    nc, cin = fuse2_w.shape[0], fuse2_w.shape[1]
    dw = jnp.asarray(deconv_w, jnp.float32)                  # [ci, co, ky, kx]
    f2 = jnp.asarray(fuse2_w, jnp.float32).reshape(nc, cin)  # [ci_nc, c]
    # phase p=0 uses input offsets {-1, 0} with deconv taps {3, 1};
    # phase p=1 uses input offsets { 0,+1} with deconv taps {2, 0}.
    tapmap = {0: ((0, 3), (1, 1)), 1: ((1, 2), (2, 0))}
    w3 = jnp.zeros((4 * nc, nc, 3, 3), jnp.float32)
    for py in (0, 1):
        for px in (0, 1):
            ph = py * 2 + px
            for ry, kky in tapmap[py]:
                for rx, kkx in tapmap[px]:
                    w3 = w3.at[ph * nc:(ph + 1) * nc, :, ry, rx].set(
                        dw[:, :, kky, kkx].T)
    # compose with the 1x1 conv (nc <- 256): contract the nc input channels
    return jnp.einsum('ocyx,ck->okyx', w3, f2)               # [4*nc, cin, 3, 3]


# ---------------------------------------------------------------------------
# Parameters (deterministic synthetic init; deconv gets exact bilinear init)
# ---------------------------------------------------------------------------
def bilinear_deconv_weight(c, k):
    f = (k + 1) // 2
    center = f - 1 if k % 2 == 1 else f - 0.5
    og = np.arange(k, dtype=np.float32)
    filt = 1.0 - np.abs(og - center) / f
    weight = np.outer(filt, filt)
    w = np.zeros((c, c, k, k), dtype=np.float32)
    for i in range(c):
        w[i, i] = weight
    return jnp.asarray(w)


def init_params(num_classes, key):
    keys = jax.random.split(key, 7)

    def w(k_, shape, fan_in):
        return jax.random.normal(k_, shape, jnp.float32) / np.sqrt(fan_in)

    return {
        'res3_conv': w(keys[0], (128, 128, 3, 3), 128 * 9),
        'res4_conv': w(keys[1], (256, 256, 3, 3), 256 * 9),
        'pool_conv0': w(keys[2], (128, 512, 1, 1), 512),
        'pool_conv1': w(keys[3], (256, 512, 1, 1), 512),
        'pool_conv2': w(keys[4], (512, 512, 1, 1), 512),
        'fuse_conv1': w(keys[5], (256, 1792, 3, 3), 1792 * 9),
        'fuse_conv2': w(keys[6], (num_classes, 256, 1, 1), 256),
        'deconv': bilinear_deconv_weight(num_classes, 4),
    }


# ---------------------------------------------------------------------------
# Forward pass (mirrors DSPNetSegmentationHead.forward)
# ---------------------------------------------------------------------------
_POOL_SIZES = [(4, 8), (8, 16), (16, 32)]
_POOL_OUT_CH = [128, 256, 512]


def dspnet_seg_head_forward(params, res3_feat, res4_feat, res5_feat):
    # NCHW (PyTorch) -> NHWC (kernel layout)
    to_nhwc = lambda t: jnp.transpose(jnp.asarray(t, jnp.float32), (0, 2, 3, 1))
    x3, x4, x5 = map(to_nhwc, (res3_feat, res4_feat, res5_feat))
    B, H3, W3, _ = x3.shape
    H4, W4 = x4.shape[1], x4.shape[2]
    H5, W5 = x5.shape[1], x5.shape[2]

    # res3 branch
    res3_out = conv2d_nhwc(x3, params['res3_conv'])                 # [B,H3,W3,128]

    # res4 branch (3x3 conv) and raw res5 both need a bilinear resize to
    # (H3, W3); when they share a source resolution do both in one spatial GEMM.
    res4_c = conv2d_nhwc(x4, params['res4_conv'])                   # [B,H4,W4,256]
    if (H4, W4) == (H5, W5):
        cat45 = jnp.concatenate([res4_c.astype(jnp.bfloat16),
                                 x5.astype(jnp.bfloat16)], axis=-1)
        U45 = _bilinear_upsample_matrix((H4, W4), (H3, W3), B)
        up45 = [apply_spatial(U45, cat45, (H3, W3))]                # [B,H3,W3,768]
    else:
        U4 = _bilinear_upsample_matrix((H4, W4), (H3, W3), B)
        U5 = _bilinear_upsample_matrix((H5, W5), (H3, W3), B)
        up45 = [apply_spatial(U4, res4_c, (H3, W3)),
                apply_spatial(U5, x5, (H3, W3))]

    # Global-pool branches: pooling, 1x1 conv and bilinear upsample all commute,
    # so run the three 1x1 convs on res5 once (merged into a single GEMM), then
    # apply one composed pool+upsample spatial matrix per branch.
    w_all = jnp.concatenate(
        [params['pool_conv0'].reshape(_POOL_OUT_CH[0], 512),
         params['pool_conv1'].reshape(_POOL_OUT_CH[1], 512),
         params['pool_conv2'].reshape(_POOL_OUT_CH[2], 512)], axis=0).T  # [512, 896]
    pool_c = pallas_matmul(x5.reshape(B * H5 * W5, 512).astype(jnp.bfloat16), w_all)
    pool_c = pool_c.reshape(B, H5, W5, sum(_POOL_OUT_CH))

    pool_feats = []
    ch = 0
    for (ph, pw), cout in zip(_POOL_SIZES, _POOL_OUT_CH):
        UP = _pool_upsample_matrix((H5, W5), (ph, pw), (H3, W3), B)
        branch = pool_c[..., ch:ch + cout]
        pool_feats.append(apply_spatial(UP, branch, (H3, W3)))
        ch += cout

    # Fuse
    concat = jnp.concatenate([res3_out] + up45 + pool_feats, axis=-1)   # [B,H3,W3,1792]
    fuse1 = conv2d_nhwc(concat, params['fuse_conv1'], apply_relu=True)  # [B,H3,W3,256]

    # fuse_conv2 + deconv, fused into a single 3x3 conv producing 4 phases
    nc = params['fuse_conv2'].shape[0]
    w_fused = _build_fused_deconv_weight(params['fuse_conv2'], params['deconv'])
    phases = conv2d_nhwc(fuse1, w_fused)                                # [B,H3,W3,4*nc]
    y = phases.reshape(B, H3, W3, 2, 2, nc)                             # [...,py,px,c]
    y = jnp.transpose(y, (0, 1, 3, 2, 4, 5)).reshape(B, 2 * H3, 2 * W3, nc)
    return jnp.transpose(y, (0, 3, 1, 2))                               # NCHW


# ---------------------------------------------------------------------------
if __name__ == "__main__":
    key = jax.random.PRNGKey(0)
    k1, k2, k3, kp = jax.random.split(key, 4)

    num_classes = 8
    B = 2
    # Channel counts are fixed by the module (128 / 256 / 512); spatial kept small.
    res3 = jax.random.normal(k1, (B, 128, 16, 16), jnp.float32)
    res4 = jax.random.normal(k2, (B, 256, 8, 8), jnp.float32)
    res5 = jax.random.normal(k3, (B, 512, 8, 8), jnp.float32)

    params = init_params(num_classes, kp)
    out = dspnet_seg_head_forward(params, res3, res4, res5)
    out = jax.block_until_ready(out)

    assert out.shape == (B, num_classes, 32, 32), out.shape
    assert bool(jnp.all(jnp.isfinite(out)))
    print("KERNEL_OK")
</pallas_src>

<mosaic_0001>
module attributes {stable_mosaic.version = 11 : i64} {
  func.func @_mm_single_kernel(%arg0: i32, %arg1: i32, %arg2: memref<256x1152xbf16, #tpu.memory_space<vmem>>, %arg3: memref<1152x128xbf16, #tpu.memory_space<vmem>>, %arg4: memref<256x128xf32, #tpu.memory_space<vmem>>) attributes {dimension_semantics = [#tpu.dimension_semantics<parallel>, #tpu.dimension_semantics<parallel>], iteration_bounds = array<i64: 2, 1>, scalar_prefetch = 0 : i64, scratch_operands = 0 : i64, tpu.core_type = #tpu.core_type<tc>, window_params = [{transform_indices = @transform_0, window_bounds = array<i64: 256, 1152>}, {transform_indices = @transform_1, window_bounds = array<i64: 1152, 128>}, {transform_indices = @transform_2, window_bounds = array<i64: 256, 128>}]} {
    %c0 = arith.constant 0 : index
    %c0_0 = arith.constant 0 : index
    %0 = vector.load %arg2[%c0, %c0_0] : memref<256x1152xbf16, #tpu.memory_space<vmem>>, vector<256x1152xbf16>
    %c0_1 = arith.constant 0 : index
    %c0_2 = arith.constant 0 : index
    %1 = vector.load %arg3[%c0_1, %c0_2] : memref<1152x128xbf16, #tpu.memory_space<vmem>>, vector<1152x128xbf16>
    %cst = arith.constant dense<0.000000e+00> : vector<256x128xf32>
    %2 = tpu.matmul %0, %1, %cst {dimension_numbers = #tpu.dot_dimension_numbers<[1], [0], [0], [1], [0, 0, 1, 1], [], []>} : vector<256x1152xbf16>, vector<1152x128xbf16>, vector<256x128xf32> -> vector<256x128xf32>
    %c0_3 = arith.constant 0 : index
    %c0_4 = arith.constant 0 : index
    %3 = vector.load %arg4[%c0_3, %c0_4] : memref<256x128xf32, #tpu.memory_space<vmem>>, vector<256x128xf32>
    tpu.vector_store %arg4[%c0_3, %c0_4], %2 {strides = array<i32>} : memref<256x128xf32, #tpu.memory_space<vmem>>, vector<256x128xf32>,
    return
  }
  func.func @transform_0(%arg0: i32, %arg1: i32) -> (i32, i32) {
    %c0_i32 = arith.constant 0 : i32
    %c0_i32_0 = arith.constant 0 : i32
    return %arg0, %c0_i32 : i32, i32
  }
  func.func @transform_1(%arg0: i32, %arg1: i32) -> (i32, i32) {
    %c0_i32 = arith.constant 0 : i32
    %c0_i32_0 = arith.constant 0 : i32
    return %c0_i32, %arg1 : i32, i32
  }
  func.func @transform_2(%arg0: i32, %arg1: i32) -> (i32, i32) {
    %c0_i32 = arith.constant 0 : i32
    return %arg0, %arg1 : i32, i32
  }
}

</mosaic_0001>

<bundles_post_ra>
// kernel: tpu_custom_call.1
= control target key start
LH: loop header
LB: loop body
LE: loop exit
PB: predicated region body
PF: predicated region fallthrough
CT: control target
= control target key end

     0   :  { %7 = vsyncpa [#allocation3], 0  ;;  %s4644_s0 = inlined_call_operand.hbm [shape: bf16[512,1152], index: 0, kind: input, shape index: {}]   ;;  %s4645_s1 = inlined_call_operand.hbm [shape: bf16[1152,128], index: 1, kind: input, shape index: {}]   ;;  %s4646_s2 = inlined_call_operand.hbm [shape: f32[512,128], index: 2, kind: output, shape index: {}]  }
   0x1   :  { %9 = vsyncpa [#allocation3 + $0x1], 0 }
   0x2   :  { %10 = vsyncpa [#allocation6], 0 }
   0x3   :  { %11 = vsyncpa [#allocation4], 0 }
   0x4   :  { %13 = vsyncpa [#allocation4 + $0x1], 0  ;;  %s3922_s9 = smov 0   ;;  %s3924_s10 = smov 0  }
   0x5   :  { %s3926_s11 = smov 0   ;;  %s3928_s12 = smov 0  }
   0x6   :  { %s3930_s13 = smov 0   ;;  %s3932_s14 = smov 0  }
   0x7 LB: > { %s2621_s15 = sadd.s32 4294967295, %s3896_s14   ;;  %s2622_s16 = sadd.s32 4294967294, %s3896_s14   ;;  %s3896_s14 = sphi %s3932_s14, %s19_s14   ;;  %s3892_s13 = sphi %s3930_s13, %s4669_s13   ;;  %s3888_s12 = sphi %s3928_s12, %s4668_s12   ;;  %s3884_s11 = sphi %s3926_s11, %s4667_s11   ;;  %s3880_s10 = sphi %s3924_s10, %s4666_s10   ;;  %s3876_s9 = sphi %s3922_s9, %s4665_s9  }
   0x8   : > { %p51_p0 = scmp.ne.s32.totalorder %s3880_s10, %s3876_s9  ;;  %p3956_p1 = scmp.eq.s32.totalorder %s2621_s15, 0 }
   0x9   : > { %p3960_p2 = scmp.eq.s32.totalorder %s2621_s15, 1  ;;  %p109_p3 = scmp.eq.s32.totalorder %s2622_s16, 1 }
   0xa   : > { %s4651_s17 = scalar_select %p3956_p1, 1, 0 }
   0xb   : > { %s4652_s18 = scalar_select %p3960_p2, 1, 0 }
   0xc   : > { %p3966_p4 = por %p3956_p1, %p51_p0  ;;  %p2623_p5 = scmp.ge.s32.totalorder %s3896_s14, 1 }
   0xd   : > { %p3971_p6 = por %p109_p3, %p51_p0  ;;  %p116_p7 = scmp.lt.s32.totalorder %s3896_s14, 3 }
   0xe   : > { %s4653_s19 = scalar_select %p3966_p4, 1, 0 }
   0xf   : > { %s4654_s20 = scalar_select %p3971_p6, 1, 0 }
  0x10   : > { %p3976_p8 = pnand %p2623_p5, %p116_p7  ;;  %s3898_s22 = smov [#allocation5]  }
  0x11   : > { %s130_s23 = sshll.u32 %s3898_s22, 4  ;;  %s31_s25 = sadd.s32 1, %s3892_s13  ;;  %s131_s23 = int_to_ptr.vmem [resolvable:$true] %s130_s23 }
  0x12   : > { %s4655_s21 = scalar_select %p3976_p8, 1, 0 }
  0x13   : > { %p3401_p9 = pneg %p3976_p8  ;;  %s3752_s28 = scalar_lea.hbm %s4645_s1, 9216 }
  0x14   : > { %p3753_p12 = scmp.ne.s32.totalorder %s4645_s1, %s3752_s28  ;;  %p3759_p5 = scmp.lt.u32.totalorder %s3752_s28, %s4645_s1 }
  0x15   : > { %p3985_p11 = pnand %p3401_p9, %p3956_p1 }
  0x17   : > { %p3754_p13 = pneg %p3985_p11 }
  0x19   : > { %p3755_p0 = pnand %p3754_p13, %p3753_p12 }
  0x1b   : > { %p3756_p3 = pneg %p3755_p0 }
  0x1d   : > { %p3761_p7 = pnand %p3759_p5, %p3756_p3 }
  0x1f   : > { %3764 = shalt.err (!%p3761_p7)
}
  0x20   : > { %s3765_s5 = scalar_lea.vmem %s131_s23, 9216  ;;  %p3773_p1 = scmp.lt.s32.totalorder %s131_s23, %s131_s23 }
  0x21   : > { %p3766_p9 = scmp.ne.s32.totalorder %s131_s23, %s3765_s5  ;;  %p3774_p4 = scmp.lt.s32.totalorder %s3765_s5, %s3765_s5 }
  0x23   : > { %p3768_p10 = pnand %p3766_p9, %p3754_p13  ;;  %p3775_p8 = por %p3774_p4, %p3773_p1 }
  0x25   : > { %p3769_p6 = pneg %p3768_p10 }
  0x27   : > { %p3776_p2 = pnand %p3775_p8, %p3769_p6 }
  0x29   : > { %3779 = shalt.err (!%p3776_p2)
}
  0x2a   : > { %s3899_s6 = smov 64   ;;  %s3900_s7 = smov 4  }
  0x2b   : > { %3404 = dma.hbm_to_vmem [thread:$0]  (!%p3985_p11), %s4645_s1, 9216, %s131_s23, [#allocation6], %s3899_s6, %s3899_s6, %s3900_s7  }
  0x2c   : > { %p33_p1 = scmp.ge.s32.totalorder %s31_s25, 2  ;;  %s38_s16 = sadd.s32 1, %s3884_s11 }
  0x2d   : > { %p45_p2 = scmp.ne.s32.totalorder %s3884_s11, %s3880_s10  ;;  %p46_p4 = scmp.eq.s32.totalorder %s3896_s14, 0 }
  0x2e   : > { %s4671_s25 = smov (%p33_p1, %s31_s25), 0  ;;  %p4657_p8 = scmp.ne.s32.totalorder %s4652_s18, 0 }
  0x2f   : > { %p47_p6 = por %p46_p4, %p45_p2  ;;  %s35_s26 = ssub.s32 %s3892_s13, %s4671_s25 }
  0x30   : > { %p4014_p10 = por %p4657_p8, %p45_p2  ;;  %p3414_p12 = scmp.lt.s32.totalorder %s3896_s14, 2 }
  0x31   : > { %p36_p13 = scmp.eq.s32.totalorder %s35_s26, 0  ;;  %s144_s24 = sand.u32 1, %s3884_s11  }
  0x32   : > { %s3390_s27 = smul.u32 1152, %s144_s24  ;;  %p4026_p11 = pnand %p3414_p12, %p47_p6 }
  0x33   : > { %s4023_s28 = scalar_select %p36_p13, %s3884_s11, %s38_s16  }
  0x34   : > { %s3391_s23 = smul.u32 18432, %s3892_s13  ;;  %s148_s29 = scalar_lea.vmem [#allocation2], %s3390_s27 }
  0x35   : > { %s156_s30 = sshll.u32 %s148_s29, 4  ;;  %s4037_s6 = scalar_lea.sflag [#allocation3], %s144_s24  ;;  %s4035_s30 = int_to_ptr.vmem [resolvable:$true] %s156_s30 }
  0x36   : > { %s4033_s5 = scalar_lea.hbm %s4644_s0, %s3391_s23  ;;  %p3782_p3 = pneg %p4026_p11 }
  0x37   : > { %s3780_s7 = scalar_lea.hbm %s4033_s5, 18432  ;;  %s3785_s16 = scalar_lea.hbm %s4644_s0, 36864 }
  0x38   : > { %p3781_p0 = scmp.ne.s32.totalorder %s4033_s5, %s3780_s7  ;;  %p3786_p9 = scmp.lt.u32.totalorder %s4033_s5, %s4644_s0 }
  0x39   : > { %p3787_p1 = scmp.lt.u32.totalorder %s3785_s16, %s3780_s7  ;;  %p3789_p4 = scmp.lt.u32.totalorder %s3780_s7, %s4033_s5 }
  0x3a   : > { %p3783_p5 = pnand %p3782_p3, %p3781_p0 }
  0x3b   : > { %p3788_p2 = por %p3787_p1, %p3786_p9 }
  0x3c   : > { %p3784_p7 = pneg %p3783_p5 }
  0x3d   : > { %p3790_p6 = por %p3789_p4, %p3788_p2 }
  0x3f   : > { %p3791_p8 = pnand %p3790_p6, %p3784_p7 }
  0x41   : > { %3794 = shalt.err (!%p3791_p8)
}
  0x42   : > { %s3795_s24 = scalar_lea.vmem %s4035_s30, 18432  ;;  %s3901_s23 = smov [#allocation2]  }
  0x43   : > { %p3796_p12 = scmp.ne.s32.totalorder %s4035_s30, %s3795_s24  ;;  %s3800_s29 = sshll.u32 %s3901_s23, 4  ;;  %s3801_s29 = int_to_ptr.vmem [resolvable:$false] %s3800_s29 }
  0x44   : > { %s3802_s4 = scalar_lea.vmem %s3801_s29, 36864  ;;  %p3803_p5 = scmp.lt.s32.totalorder %s4035_s30, %s3801_s29 }
  0x45   : > { %p3798_p13 = pnand %p3796_p12, %p3782_p3  ;;  %p3804_p9 = scmp.lt.s32.totalorder %s3802_s4, %s3795_s24 }
  0x47   : > { %p3799_p0 = pneg %p3798_p13  ;;  %p3805_p1 = por %p3804_p9, %p3803_p5 }
  0x49   : > { %p3806_p2 = pnand %p3805_p1, %p3799_p0 }
  0x4b   : > { %3809 = shalt.err (!%p3806_p2)
}
  0x4c   : > { %s3902_s18 = smov 576   ;;  %s3903_s7 = smov 36  }
  0x4d   : > { %3408 = dma.hbm_to_vmem [thread:$0]  (!%p4026_p11), %s4033_s5, 18432, %s4035_s30, %s4037_s6, %s3902_s18, %s3902_s18, %s3903_s7  }
  0x4e   : > { %p4660_p3 = scmp.ne.s32.totalorder %s4655_s21, 0 }
  0x4f   : > { %s4068_s8 = sand.u32 (!%p4660_p3), 1, %s3880_s10   ;;  %p4661_p7 = scmp.ne.s32.totalorder (!%p4660_p3), %s4653_s19, 0 }
  0x50   : > { %168 = sbr.rel (%p4660_p3) target bundleno = 640 (0x280), region = 28  ;;  %s171_s16 = scalar_lea.sflag (!%p4660_p3), [#allocation3], %s4068_s8 }
  0x51   : > { %s3392_s15 = smul.u32 (!%p4660_p3), 1152, %s4068_s8 }
  0x53   : > { %s4072_s26 = scalar_lea.vmem (!%p4660_p3), [#allocation2], %s3392_s15 }
  0x57   : > { %3863 = dma.done.wait (%p4661_p7), %s171_s16, 18432  }
  0x58   : > { %3865 = vsyncadd (%p4661_p7), %s171_s16, 4294948864  ;;  %p4662_p11 = scmp.ne.s32.totalorder %s4651_s17, 0 }
  0x5a   : > { %3867 = dma.done.wait (%p4662_p11), [#allocation6], 9216  }
  0x5b   : > { %3869 = vsyncadd (%p4662_p11), [#allocation6], 4294958080  ;;  %v3472_v0 = vld [vmem:[#allocation5 + $0x40] sm:$0xff]   ;;  %v3474_v2 = vld [vmem:[#allocation5 + $0x48] sm:$0xff]   ;;  %s2631_s17 = sshll.u32 %s4068_s8, 8  ;;  %s2853_s21 = sshll.u32 %s3888_s12, 12 }
  0x5c   : > { %v3473_v1 = vld [vmem:[#allocation5] sm:$0xff]   ;;  %2854 = vmatprep.subr.bf16.mxu0 %v3472_v0  ;;  %3374 = vmatprep.subr.bf16.mxu1 %v3472_v0  ;;  %v3475_v3 = vld [vmem:[#allocation5 + $0x8] sm:$0xff]   ;;  %v3476_v4 = vld [vmem:[#allocation5 + $0x50] sm:$0xff]   ;;  %s4518_s19 = scalar_lea.vmem [#allocation7], %s2631_s17  ;;  %s4591_s6 = scalar_lea.hbm %s4646_s2, %s2853_s21 }
  0x5d   : > { %2855 = vmatpush3.bf16.msra.mxu0 %v3473_v1  ;;  %3382 = vmatpush3.bf16.msra.mxu1 %v3473_v1  ;;  %v3477_v5 = vld [vmem:[#allocation5 + $0x10] sm:$0xff]   ;;  %v3478_v6 = vld [vmem:[#allocation5 + $0x58] sm:$0xff]   ;;  %v3480_v8 = vld [vmem:[#allocation5 + $0x60] sm:$0xff]   ;;  %s2526_s30 = sshll.u32 %s4518_s19, 4  ;;  %s2512_s27 = scalar_lea.sflag [#allocation4], %s4068_s8  ;;  %s4593_s30 = int_to_ptr.vmem [resolvable:$true] %s2526_s30 }
  0x5e   : > { %2856 = vmatprep.subr.bf16.mxu0 %v3474_v2  ;;  %3375 = vmatprep.subr.bf16.mxu1 %v3474_v2  ;;  %v3479_v7 = vld [vmem:[#allocation5 + $0x18] sm:$0xff]   ;;  %v3481_v9 = vld [vmem:[#allocation5 + $0x20] sm:$0xff]   ;;  %v3482_v10 = vld [vmem:[#allocation5 + $0x68] sm:$0xff]   ;;  %s3810_s12 = scalar_lea.vmem %s4593_s30, 4096  ;;  %s3904_s24 = smov [#allocation7]  }
  0x5f   : > { %v3490_v11 = vld [vmem:[%s4072_s26 + $0x4] ss:$36 sps:$4 sm:$0xff]   ;;  %v3484_v14 = vld [vmem:[#allocation5 + $0x70] sm:$0xff]   ;;  %v3486_v16 = vld [vmem:[#allocation5 + $0x78] sm:$0xff]   ;;  %p3811_p4 = scmp.ne.s32.totalorder %s4593_s30, %s3810_s12  ;;  %s3814_s23 = sshll.u32 %s3904_s24, 4  ;;  %s3815_s23 = int_to_ptr.vmem [resolvable:$false] %s3814_s23 }
  0x60   : > { %v3493_v12 = vld [vmem:[%s4072_s26 + $0x364] ss:$36 sps:$4 sm:$0xff]   ;;  %1706 = vmatprep.mubr.bf16.mxu0 %v3490_v11  ;;  %v3485_v15 = vld [vmem:[#allocation5 + $0x30] sm:$0xff]   ;;  %v3487_v17 = vld [vmem:[#allocation5 + $0x38] sm:$0xff]   ;;  %s3816_s29 = scalar_lea.vmem %s3815_s23, 8192  ;;  %p3817_p12 = scmp.lt.s32.totalorder %s4593_s30, %s3815_s23 }
  0x61   : > { %2857 = vmatpush3.bf16.msra.mxu0 %v3475_v3  ;;  %3383 = vmatpush3.bf16.msra.mxu1 %v3475_v3  ;;  %v3483_v13 = vld [vmem:[#allocation5 + $0x28] sm:$0xff]   ;;  %v3494_v18 = vld [vmem:[#allocation5 + $0xc0] sm:$0xff]   ;;  %v3506_v31 = vld [vmem:[#allocation5 + $0xd0] sm:$0xff]   ;;  %p3812_p6 = pnand %p3811_p4, %p4014_p10  ;;  %p3818_p13 = scmp.lt.s32.totalorder %s3816_s29, %s3810_s12 }
  0x62   : > { %2858 = vmatprep.subr.bf16.mxu0 %v3476_v4  ;;  %3376 = vmatprep.subr.bf16.mxu1 %v3476_v4  ;;  %v3488_v19 = vld [vmem:[%s4072_s26] ss:$36 sps:$4 sm:$0xff]   ;;  %v3496_v23 = vld [vmem:[#allocation5 + $0xc8] sm:$0xff]   ;;  %v3507_v32 = vld [vmem:[#allocation5 + $0x90] sm:$0xff]  }
  0x63   : > { %1802 = vmatprep.mubr.bf16.mxu1 %v3493_v12  ;;  %v3491_v20 = vld [vmem:[%s4072_s26 + $0x360] ss:$36 sps:$4 sm:$0xff]   ;;  %v3500_v25 = vld [vmem:[%s4072_s26 + $0x4c] ss:$36 sps:$4 sm:$0xff]   ;;  %v3508_v34 = vld [vmem:[#allocation5 + $0xd8] sm:$0xff]   ;;  %p3813_p8 = pneg %p3812_p6  ;;  %p3819_p0 = por %p3818_p13, %p3817_p12 }
  0x64   : > { %v3497_v21 = vld [vmem:[#allocation5 + $0x140] sm:$0xff]   ;;  %v3502_v26 = vld [vmem:[%s4072_s26 + $0x3ac] ss:$36 sps:$4 sm:$0xff]   ;;  %v3510_v35 = vld [vmem:[%s4072_s26 + $0x94] ss:$36 sps:$4 sm:$0xff]  }
  0x65   : > { %2859 = vmatpush3.bf16.msra.mxu0 %v3477_v5  ;;  %3384 = vmatpush3.bf16.msra.mxu1 %v3477_v5  ;;  %v3495_v22 = vld [vmem:[#allocation5 + $0x80] sm:$0xff]   ;;  %v3498_v27 = vld [vmem:[#allocation5 + $0x88] sm:$0xff]   ;;  %v3512_v36 = vld [vmem:[%s4072_s26 + $0x3f4] ss:$36 sps:$4 sm:$0xff]   ;;  %p3820_p5 = pnand %p3819_p0, %p3813_p8 }
  0x66   : > { %2860 = vmatprep.subr.bf16.mxu0 %v3478_v6  ;;  %3377 = vmatprep.subr.bf16.mxu1 %v3478_v6  ;;  %v3499_v24 = vld [vmem:[#allocation5 + $0x100] sm:$0xff]   ;;  %v3517_v28 = vld [vmem:[#allocation5 + $0x148] sm:$0xff]   ;;  %v3509_v37 = vld [vmem:[#allocation5 + $0x98] sm:$0xff]  }
  0x67   : > { %v3504_v29 = vld [vmem:[%s4072_s26 + $0x48] ss:$36 sps:$4 sm:$0xff]   ;;  %v3514_v38 = vld [vmem:[%s4072_s26 + $0x90] ss:$36 sps:$4 sm:$0xff]   ;;  %v3516_v40 = vld [vmem:[#allocation5 + $0xe0] sm:$0xff]  }
  0x68   : > { %v3505_v30 = vld [vmem:[%s4072_s26 + $0x3a8] ss:$36 sps:$4 sm:$0xff]   ;;  %v3515_v39 = vld [vmem:[%s4072_s26 + $0x3f0] ss:$36 sps:$4 sm:$0xff]   ;;  %v3518_v41 = vld [vmem:[#allocation5 + $0xa0] sm:$0xff]  }
  0x69   : > { %2861 = vmatpush3.bf16.msra.mxu0 %v3479_v7  ;;  %3385 = vmatpush3.bf16.msra.mxu1 %v3479_v7  ;;  %v3519_v33 = vld [vmem:[#allocation5 + $0x108] sm:$0xff]   ;;  %v3531_v43 = vld [vmem:[#allocation5 + $0x150] sm:$0xff]   ;;  %v3522_v44 = vld [vmem:[%s4072_s26 + $0xdc] ss:$36 sps:$4 sm:$0xff]  }
  0x6a   : > { %2862 = vmatprep.subr.bf16.mxu0 %v3480_v8  ;;  %3378 = vmatprep.subr.bf16.mxu1 %v3480_v8  ;;  %v3520_v42 = vld [vmem:[#allocation5 + $0xe8] sm:$0xff]   ;;  %v3524_v45 = vld [vmem:[%s4072_s26 + $0x43c] ss:$36 sps:$4 sm:$0xff]   ;;  %v3533_v46 = vld [vmem:[#allocation5 + $0x110] sm:$0xff]  }
  0x6b   : > { %v3521_v47 = vld [vmem:[#allocation5 + $0xa8] sm:$0xff]   ;;  %v3528_v48 = vld [vmem:[#allocation5 + $0xf0] sm:$0xff]   ;;  %v3526_v49 = vld [vmem:[%s4072_s26 + $0xd8] ss:$36 sps:$4 sm:$0xff]  }
  0x6c   : > { %v3527_v50 = vld [vmem:[%s4072_s26 + $0x438] ss:$36 sps:$4 sm:$0xff]   ;;  %v3529_v51 = vld [vmem:[#allocation5 + $0xb0] sm:$0xff]   ;;  %v3534_v53 = vld [vmem:[%s4072_s26 + $0x124] ss:$36 sps:$4 sm:$0xff]  }
  0x6d   : > { %2863 = vmatpush3.bf16.msra.mxu0 %v3481_v9  ;;  %3386 = vmatpush3.bf16.msra.mxu1 %v3481_v9  ;;  %v3530_v52 = vld [vmem:[#allocation5 + $0xf8] sm:$0xff]   ;;  %v3538_v54 = vld [vmem:[%s4072_s26 + $0xc] ss:$36 sps:$4 sm:$0xff]   ;;  %v3539_v59 = vld [vmem:[%s4072_s26 + $0x120] ss:$36 sps:$4 sm:$0xff]  }
  0x6e   : > { %2864 = vmatprep.subr.bf16.mxu0 %v3482_v10  ;;  %3379 = vmatprep.subr.bf16.mxu1 %v3482_v10  ;;  %v3548_v55 = vld [vmem:[#allocation5 + $0x158] sm:$0xff]   ;;  %v3536_v58 = vld [vmem:[%s4072_s26 + $0x8] ss:$36 sps:$4 sm:$0xff]   ;;  %v3540_v60 = vld [vmem:[#allocation5 + $0x1c0] sm:$0xff]  }
  0x6f   : > { %v3549_v56 = vld [vmem:[#allocation5 + $0x118] sm:$0xff]   ;;  %v3541_v61 = vld [vmem:[#allocation5 + $0x180] sm:$0xff]   ;;  %v3542_v62 = vld [vmem:[%s4072_s26 + $0x16c] ss:$36 sps:$4 sm:$0xff]  }
  0x70   : > { %v3532_v57 = vld [vmem:[#allocation5 + $0xb8] sm:$0xff]   ;;  %v3558_v0 = vld [vmem:[#allocation5 + $0x160] sm:$0xff]   ;;  %v3556_v1 = vld [vmem:[#allocation5 + $0x1c8] sm:$0xff]  }
  0x71   : > { %2865 = vmatpush3.bf16.msra.mxu0 %v3483_v13  ;;  %3387 = vmatpush3.bf16.msra.mxu1 %v3483_v13  ;;  %v3544_v63 = vld [vmem:[%s4072_s26 + $0x54] ss:$36 sps:$4 sm:$0xff]   ;;  %v3559_v2 = vld [vmem:[#allocation5 + $0x120] sm:$0xff]   ;;  %v3557_v3 = vld [vmem:[#allocation5 + $0x188] sm:$0xff]  }
  0x72   : > { %2866 = vmatprep.subr.bf16.mxu0 %v3484_v14  ;;  %3380 = vmatprep.subr.bf16.mxu1 %v3484_v14  ;;  %v3546_v4 = vld [vmem:[%s4072_s26 + $0x168] ss:$36 sps:$4 sm:$0xff]   ;;  %v3547_v5 = vld [vmem:[%s4072_s26 + $0x50] ss:$36 sps:$4 sm:$0xff]   ;;  %v3552_v7 = vld [vmem:[%s4072_s26 + $0x9c] ss:$36 sps:$4 sm:$0xff]  }
  0x73   : > { %v3550_v6 = vld [vmem:[%s4072_s26 + $0x1b4] ss:$36 sps:$4 sm:$0xff]   ;;  %v3572_v8 = vld [vmem:[#allocation5 + $0x168] sm:$0xff]   ;;  %v3560_v14 = vld [vmem:[%s4072_s26 + $0x1fc] ss:$36 sps:$4 sm:$0xff]  }
  0x74   : > { %v3573_v9 = vld [vmem:[#allocation5 + $0x1d0] sm:$0xff]   ;;  %v3574_v10 = vld [vmem:[#allocation5 + $0x128] sm:$0xff]   ;;  %v3555_v13 = vld [vmem:[%s4072_s26 + $0x98] ss:$36 sps:$4 sm:$0xff]  }
  0x75   : > { %2867 = vmatpush3.bf16.msra.mxu0 %v3485_v15  ;;  %3388 = vmatpush3.bf16.msra.mxu1 %v3485_v15  ;;  %v3575_v11 = vld [vmem:[#allocation5 + $0x190] sm:$0xff]  }
  0x76   : > { %2868 = vmatprep.subr.bf16.mxu0 %v3486_v16  ;;  %3381 = vmatprep.subr.bf16.mxu1 %v3486_v16  ;;  %v3554_v12 = vld [vmem:[%s4072_s26 + $0x1b0] ss:$36 sps:$4 sm:$0xff]  }
  0x77   : > { %v3582_v15 = vld [vmem:[#allocation5 + $0x170] sm:$0xff]  }
  0x78   : > { %v3583_v16 = vld [vmem:[#allocation5 + $0x130] sm:$0xff]  }
  0x79   : > { %2869 = vmatpush3.bf16.msra.mxu0 %v3487_v17  ;;  %3389 = vmatpush3.bf16.msra.mxu1 %v3487_v17  ;;  %v3562_v17 = vld [vmem:[%s4072_s26 + $0xe4] ss:$36 sps:$4 sm:$0xff]  }
  0x7a   : > { %2966 = vmatprep.subr.bf16.mxu1 %v3494_v18  ;;  %3078 = vmatprep.subr.bf16.mxu0 %v3497_v21  ;;  %v3590_v18 = vld [vmem:[#allocation5 + $0x1d8] sm:$0xff]   ;;  %v3565_v21 = vld [vmem:[%s4072_s26 + $0xe0] ss:$36 sps:$4 sm:$0xff]  }
  0x7c   : > { %1707 = vmatmul.mubr.bf16.vlgmr.msra.gmra.mrb[0].mxu0 %v3488_v19  ;;  %1803 = vmatmul.mubr.bf16.vlgmr.msra.gmra.mrb[0].mxu1 %v3491_v20  ;;  %v3591_v19 = vld [vmem:[#allocation5 + $0x198] sm:$0xff]  }
  0x7d   : > { %2967 = vmatpush3.bf16.msra.mxu1 %v3495_v22  ;;  %3079 = vmatpush3.bf16.msra.mxu0 %v3499_v24  ;;  %v3564_v20 = vld [vmem:[%s4072_s26 + $0x1f8] ss:$36 sps:$4 sm:$0xff]   ;;  %v3566_v22 = vld [vmem:[%s4072_s26 + $0x244] ss:$36 sps:$4 sm:$0xff]  }
  0x7e   : > { %2968 = vmatprep.subr.bf16.mxu1 %v3496_v23  ;;  %1714 = vmatprep.mubr.bf16.mxu0 %v3500_v25  ;;  %v3568_v23 = vld [vmem:[%s4072_s26 + $0x12c] ss:$36 sps:$4 sm:$0xff]   ;;  %v3598_v24 = vld [vmem:[#allocation5 + $0x178] sm:$0xff]  }
  0x7f   : > { %1810 = vmatprep.mubr.bf16.mxu1 %v3502_v26  ;;  %3080 = vmatprep.subr.bf16.mxu0 %v3517_v28  ;;  %v3599_v25 = vld [vmem:[#allocation5 + $0x138] sm:$0xff]   ;;  %v3606_v26 = vld [vmem:[#allocation5 + $0x1e0] sm:$0xff]  }
  0x80   : > { %v3607_v28 = vld [vmem:[#allocation5 + $0x1a0] sm:$0xff]  }
  0x81   : > { %2969 = vmatpush3.bf16.msra.mxu1 %v3498_v27  ;;  %3081 = vmatpush3.bf16.msra.mxu0 %v3519_v33  ;;  %v3570_v27 = vld [vmem:[%s4072_s26 + $0x240] ss:$36 sps:$4 sm:$0xff]   ;;  %v3621_v33 = vld [vmem:[#allocation5 + $0x1e8] sm:$0xff]  }
  0x82   : > { %2970 = vmatprep.subr.bf16.mxu1 %v3506_v31  ;;  %3082 = vmatprep.subr.bf16.mxu0 %v3531_v43  ;;  %v3576_v31 = vld [vmem:[%s4072_s26 + $0x28c] ss:$36 sps:$4 sm:$0xff]   ;;  %v3592_v43 = vld [vmem:[%s4072_s26 + $0x31c] ss:$36 sps:$4 sm:$0xff]  }
  0x84   : > { %1715 = vmatmul.mubr.bf16.gmra.mrb[4].mxu0 %v3504_v29  ;;  %1811 = vmatmul.mubr.bf16.gmra.mrb[4].mxu1 %v3505_v30  ;;  %v3608_v29 = vld [vmem:[#allocation5 + $0x200] sm:$0xff]   ;;  %v3571_v30 = vld [vmem:[%s4072_s26 + $0x128] ss:$36 sps:$4 sm:$0xff]  }
  0x85   : > { %2971 = vmatpush3.bf16.msra.mxu1 %v3507_v32  ;;  %1722 = vmatprep.mubr.bf16.mxu0 %v3510_v35  ;;  %v3578_v32 = vld [vmem:[%s4072_s26 + $0x174] ss:$36 sps:$4 sm:$0xff]   ;;  %v3622_v35 = vld [vmem:[#allocation5 + $0x1a8] sm:$0xff]  }
  0x86   : > { %2972 = vmatprep.subr.bf16.mxu1 %v3508_v34  ;;  %1818 = vmatprep.mubr.bf16.mxu1 %v3512_v36  ;;  %v3580_v34 = vld [vmem:[%s4072_s26 + $0x288] ss:$36 sps:$4 sm:$0xff]   ;;  %v3581_v36 = vld [vmem:[%s4072_s26 + $0x170] ss:$36 sps:$4 sm:$0xff]  }
  0x87   : > { %3083 = vmatpush3.bf16.msra.mxu0 %v3533_v46  ;;  %v3597_v46 = vld [vmem:[%s4072_s26 + $0x200] ss:$36 sps:$4 sm:$0xff]  }
  0x88   : > { %3084 = vmatprep.subr.bf16.mxu0 %v3548_v55  ;;  %v3623_v55 = vld [vmem:[#allocation5 + $0x208] sm:$0xff]  }
  0x89   : > { %2973 = vmatpush3.bf16.msra.mxu1 %v3509_v37  ;;  %v3584_v37 = vld [vmem:[%s4072_s26 + $0x2d4] ss:$36 sps:$4 sm:$0xff]  }
  0x8a   : > { %2974 = vmatprep.subr.bf16.mxu1 %v3516_v40  ;;  %v3589_v40 = vld [vmem:[%s4072_s26 + $0x1b8] ss:$36 sps:$4 sm:$0xff]  }
  0x8b   : > { %3085 = vmatpush3.bf16.msra.mxu0 %v3549_v56  ;;  %v3638_v56 = vld [vmem:[#allocation5 + $0x210] sm:$0xff]  }
  0x8c   : > { %1723 = vmatmul.mubr.bf16.gmra.mrb[8].mxu0 %v3514_v38  ;;  %1819 = vmatmul.mubr.bf16.gmra.mrb[8].mxu1 %v3515_v39  ;;  %v3586_v38 = vld [vmem:[%s4072_s26 + $0x1bc] ss:$36 sps:$4 sm:$0xff]   ;;  %v3588_v39 = vld [vmem:[%s4072_s26 + $0x2d0] ss:$36 sps:$4 sm:$0xff]  }
  0x8d   : > { %2975 = vmatpush3.bf16.msra.mxu1 %v3518_v41  ;;  %1730 = vmatprep.mubr.bf16.mxu0 %v3522_v44  ;;  %v3636_v41 = vld [vmem:[#allocation5 + $0x1f0] sm:$0xff]   ;;  %v3594_v44 = vld [vmem:[%s4072_s26 + $0x204] ss:$36 sps:$4 sm:$0xff]  }
  0x8e   : > { %2976 = vmatprep.subr.bf16.mxu1 %v3520_v42  ;;  %1826 = vmatprep.mubr.bf16.mxu1 %v3524_v45  ;;  %v3637_v42 = vld [vmem:[#allocation5 + $0x1b0] sm:$0xff]   ;;  %v3596_v45 = vld [vmem:[%s4072_s26 + $0x318] ss:$36 sps:$4 sm:$0xff]  }
  0x8f   : > { %3086 = vmatprep.subr.bf16.mxu0 %v3558_v0  ;;  %v3620_v0 = vld [vmem:[%s4072_s26 + $0xa0] ss:$36 sps:$4 sm:$0xff]  }
  0x90   : > { %3087 = vmatpush3.bf16.msra.mxu0 %v3559_v2  ;;  %v3626_v2 = vld [vmem:[%s4072_s26 + $0xec] ss:$36 sps:$4 sm:$0xff]  }
  0x91   : > { %2977 = vmatpush3.bf16.msra.mxu1 %v3521_v47  ;;  %3088 = vmatprep.subr.bf16.mxu0 %v3572_v8  ;;  %v3651_v47 = vld [vmem:[#allocation5 + $0x1f8] sm:$0xff]  }
  0x92   : > { %2978 = vmatprep.subr.bf16.mxu1 %v3528_v48  ;;  %v3652_v48 = vld [vmem:[#allocation5 + $0x1b8] sm:$0xff]  }
  0x93   : > { %v3632_v8 = vld [vmem:[%s4072_s26 + $0x134] ss:$36 sps:$4 sm:$0xff]  }
  0x94   : > { %1731 = vmatmul.mubr.bf16.gmra.mrb[12].mxu0 %v3526_v49  ;;  %1827 = vmatmul.mubr.bf16.gmra.mrb[12].mxu1 %v3527_v50  ;;  %v3600_v49 = vld [vmem:[%s4072_s26 + $0x24c] ss:$36 sps:$4 sm:$0xff]   ;;  %v3604_v50 = vld [vmem:[%s4072_s26 + $0x14] ss:$36 sps:$4 sm:$0xff]  }
  0x95   : > { %2979 = vmatpush3.bf16.msra.mxu1 %v3529_v51  ;;  %1738 = vmatprep.mubr.bf16.mxu0 %v3534_v53  ;;  %v3602_v51 = vld [vmem:[%s4072_s26 + $0x10] ss:$36 sps:$4 sm:$0xff]  }
  0x96   : > { %2980 = vmatprep.subr.bf16.mxu1 %v3530_v52  ;;  %1867 = vmatprep.mubr.bf16.mxu1 %v3538_v54  ;;  %v3605_v52 = vld [vmem:[%s4072_s26 + $0x248] ss:$36 sps:$4 sm:$0xff]   ;;  %v3609_v53 = vld [vmem:[%s4072_s26 + $0x294] ss:$36 sps:$4 sm:$0xff]   ;;  %v3611_v54 = vld [vmem:[%s4072_s26 + $0x5c] ss:$36 sps:$4 sm:$0xff]  }
  0x97   : > { %3089 = vmatpush3.bf16.msra.mxu0 %v3574_v10  ;;  %v3634_v10 = vld [vmem:[%s4072_s26 + $0x368] ss:$36 sps:$4 sm:$0xff]  }
  0x98   : > { %3090 = vmatprep.subr.bf16.mxu0 %v3582_v15  ;;  %v3644_v15 = vld [vmem:[%s4072_s26 + $0x178] ss:$36 sps:$4 sm:$0xff]  }
  0x99   : > { %2981 = vmatpush3.bf16.msra.mxu1 %v3532_v57  ;;  %v3613_v57 = vld [vmem:[%s4072_s26 + $0x290] ss:$36 sps:$4 sm:$0xff]  }
  0x9a   : > { %3190 = vmatprep.subr.bf16.mxu1 %v3540_v60  ;;  %v3617_v60 = vld [vmem:[%s4072_s26 + $0xa4] ss:$36 sps:$4 sm:$0xff]  }
  0x9b   : > { %3091 = vmatpush3.bf16.msra.mxu0 %v3583_v16  ;;  %v3645_v16 = vld [vmem:[%s4072_s26 + $0x3fc] ss:$36 sps:$4 sm:$0xff]  }
  0x9c   : > { %1739 = vmatmul.mubr.bf16.gmra.mrb[16].mxu0 %v3539_v59  ;;  %1868 = vmatmul.mubr.bf16.vlgmr.msra.gmra.mrb[16].mxu1 %v3536_v58  ;;  %v3614_v58 = vld [vmem:[%s4072_s26 + $0x58] ss:$36 sps:$4 sm:$0xff]  }
  0x9d   : > { %3191 = vmatpush3.bf16.msra.mxu1 %v3541_v61  ;;  %1746 = vmatprep.mubr.bf16.mxu0 %v3542_v62  ;;  %v3615_v59 = vld [vmem:[%s4072_s26 + $0x2dc] ss:$36 sps:$4 sm:$0xff]  }
  0x9e   : > { %1875 = vmatprep.mubr.bf16.mxu1 %v3544_v63  ;;  %3192 = vmatprep.subr.bf16.mxu1 %v3556_v1  ;;  %v3653_v61 = vld [vmem:[#allocation5 + $0x218] sm:$0xff]   ;;  %v3666_v62 = vld [vmem:[#allocation5 + $0x220] sm:$0xff]  }
  0x9f   : > { %3092 = vmatprep.subr.bf16.mxu0 %v3598_v24  ;;  %v3619_v63 = vld [vmem:[%s4072_s26 + $0x2d8] ss:$36 sps:$4 sm:$0xff]   ;;  %v3624_v1 = vld [vmem:[%s4072_s26 + $0x324] ss:$36 sps:$4 sm:$0xff]  }
  0xa0   : > { %3093 = vmatpush3.bf16.msra.mxu0 %v3599_v25  ;;  %v3660_v24 = vld [vmem:[%s4072_s26 + $0x254] ss:$36 sps:$4 sm:$0xff]   ;;  %v3664_v25 = vld [vmem:[%s4072_s26 + $0x1c] ss:$36 sps:$4 sm:$0xff]  }
  0xa1   : > { %3193 = vmatpush3.bf16.msra.mxu1 %v3557_v3  ;;  %3326 = vmatprep.subr.bf16.mxu0 %v3608_v29  ;;  %v3679_v3 = vld [vmem:[#allocation5 + $0x228] sm:$0xff]  }
  0xa2   : > { %3194 = vmatprep.subr.bf16.mxu1 %v3573_v9  ;;  %v3705_v9 = vld [vmem:[#allocation5 + $0x238] sm:$0xff]  }
  0xa4   : > { %1747 = vmatmul.mubr.bf16.gmra.mrb[20].mxu0 %v3546_v4  ;;  %1876 = vmatmul.mubr.bf16.gmra.mrb[20].mxu1 %v3547_v5  ;;  %v3628_v4 = vld [vmem:[%s4072_s26 + $0x320] ss:$36 sps:$4 sm:$0xff]   ;;  %v3629_v5 = vld [vmem:[%s4072_s26 + $0xe8] ss:$36 sps:$4 sm:$0xff]  }
  0xa5   : > { %1754 = vmatprep.mubr.bf16.mxu0 %v3550_v6  ;;  %1883 = vmatprep.mubr.bf16.mxu1 %v3552_v7  ;;  %v3692_v6 = vld [vmem:[#allocation5 + $0x230] sm:$0xff]  }
  0xa6   : > { %3195 = vmatpush3.bf16.msra.mxu1 %v3575_v11  ;;  %v3630_v7 = vld [vmem:[%s4072_s26 + $0x36c] ss:$36 sps:$4 sm:$0xff]  }
  0xa7   : > { %3196 = vmatprep.subr.bf16.mxu1 %v3590_v18  ;;  %v3635_v11 = vld [vmem:[%s4072_s26 + $0x130] ss:$36 sps:$4 sm:$0xff]   ;;  %v3649_v18 = vld [vmem:[%s4072_s26 + $0x3f8] ss:$36 sps:$4 sm:$0xff]  }
  0xaa   : > { %3197 = vmatpush3.bf16.msra.mxu1 %v3591_v19  ;;  %v3650_v19 = vld [vmem:[%s4072_s26 + $0x1c0] ss:$36 sps:$4 sm:$0xff]  }
  0xab   : > { %3198 = vmatprep.subr.bf16.mxu1 %v3606_v26  ;;  %v3662_v26 = vld [vmem:[%s4072_s26 + $0x18] ss:$36 sps:$4 sm:$0xff]  }
  0xac   : > { %1755 = vmatmul.mubr.bf16.gmra.mrb[24].mxu0 %v3554_v12  ;;  %1884 = vmatmul.mubr.bf16.gmra.mrb[24].mxu1 %v3555_v13  ;;  %v3639_v12 = vld [vmem:[%s4072_s26 + $0x3b4] ss:$36 sps:$4 sm:$0xff]   ;;  %v3641_v13 = vld [vmem:[%s4072_s26 + $0x17c] ss:$36 sps:$4 sm:$0xff]  }
  0xad   : > { %1762 = vmatprep.mubr.bf16.mxu0 %v3560_v14  ;;  %1891 = vmatprep.mubr.bf16.mxu1 %v3562_v17  ;;  %v3643_v14 = vld [vmem:[%s4072_s26 + $0x3b0] ss:$36 sps:$4 sm:$0xff]   ;;  %v3647_v17 = vld [vmem:[%s4072_s26 + $0x1c4] ss:$36 sps:$4 sm:$0xff]  }
  0xae   : > { %3199 = vmatpush3.bf16.msra.mxu1 %v3607_v28  ;;  %v3667_v28 = vld [vmem:[%s4072_s26 + $0x29c] ss:$36 sps:$4 sm:$0xff]  }
  0xaf   : > { %3200 = vmatprep.subr.bf16.mxu1 %v3621_v33  ;;  %v3675_v33 = vld [vmem:[%s4072_s26 + $0xac] ss:$36 sps:$4 sm:$0xff]  }
  0xb2   : > { %3201 = vmatpush3.bf16.msra.mxu1 %v3622_v35  ;;  %v3678_v35 = vld [vmem:[%s4072_s26 + $0xa8] ss:$36 sps:$4 sm:$0xff]  }
  0xb3   : > { %3202 = vmatprep.subr.bf16.mxu1 %v3636_v41  ;;  %v3688_v41 = vld [vmem:[%s4072_s26 + $0x13c] ss:$36 sps:$4 sm:$0xff]  }
  0xb4   : > { %1763 = vmatmul.mubr.bf16.gmra.mrb[28].mxu0 %v3564_v20  ;;  %1892 = vmatmul.mubr.bf16.gmra.mrb[28].mxu1 %v3565_v21  ;;  %v3654_v20 = vld [vmem:[%s4072_s26 + $0x444] ss:$36 sps:$4 sm:$0xff]   ;;  %v3656_v21 = vld [vmem:[%s4072_s26 + $0x20c] ss:$36 sps:$4 sm:$0xff]  }
  0xb5   : > { %1770 = vmatprep.mubr.bf16.mxu0 %v3566_v22  ;;  %1899 = vmatprep.mubr.bf16.mxu1 %v3568_v23  ;;  %v3658_v22 = vld [vmem:[%s4072_s26 + $0x440] ss:$36 sps:$4 sm:$0xff]   ;;  %v3659_v23 = vld [vmem:[%s4072_s26 + $0x208] ss:$36 sps:$4 sm:$0xff]  }
  0xb6   : > { %3203 = vmatpush3.bf16.msra.mxu1 %v3637_v42  ;;  %v3690_v42 = vld [vmem:[%s4072_s26 + $0x370] ss:$36 sps:$4 sm:$0xff]  }
  0xb7   : > { %3204 = vmatprep.subr.bf16.mxu1 %v3651_v47  ;;  %v3698_v47 = vld [vmem:[%s4072_s26 + $0x180] ss:$36 sps:$4 sm:$0xff]  }
  0xba   : > { %3205 = vmatpush3.bf16.msra.mxu1 %v3652_v48  ;;  %v3699_v48 = vld [vmem:[%s4072_s26 + $0x404] ss:$36 sps:$4 sm:$0xff]  }
  0xbc   : > { %1771 = vmatmul.mubr.bf16.gmra.mrb[32].mxu0 %v3570_v27  ;;  %1900 = vmatmul.mubr.bf16.gmra.mrb[32].mxu1 %v3571_v30  ;;  %v3665_v27 = vld [vmem:[%s4072_s26 + $0x250] ss:$36 sps:$4 sm:$0xff]   ;;  %v3671_v30 = vld [vmem:[%s4072_s26 + $0x298] ss:$36 sps:$4 sm:$0xff]  }
  0xbd   : > { %1778 = vmatprep.mubr.bf16.mxu0 %v3576_v31  ;;  %1907 = vmatprep.mubr.bf16.mxu1 %v3578_v32  ;;  %v3672_v31 = vld [vmem:[%s4072_s26 + $0x60] ss:$36 sps:$4 sm:$0xff]  }
  0xbe   : > { %v3673_v32 = vld [vmem:[%s4072_s26 + $0x2e4] ss:$36 sps:$4 sm:$0xff]  }
  0xc4   : > { %1779 = vmatmul.mubr.bf16.gmra.mrb[36].mxu0 %v3580_v34  ;;  %1908 = vmatmul.mubr.bf16.gmra.mrb[36].mxu1 %v3581_v36  ;;  %v3677_v34 = vld [vmem:[%s4072_s26 + $0x2e0] ss:$36 sps:$4 sm:$0xff]   ;;  %v3680_v36 = vld [vmem:[%s4072_s26 + $0x32c] ss:$36 sps:$4 sm:$0xff]  }
  0xc5   : > { %1786 = vmatprep.mubr.bf16.mxu0 %v3584_v37  ;;  %1915 = vmatprep.mubr.bf16.mxu1 %v3586_v38  ;;  %v3682_v37 = vld [vmem:[%s4072_s26 + $0xf4] ss:$36 sps:$4 sm:$0xff]   ;;  %v3684_v38 = vld [vmem:[%s4072_s26 + $0x328] ss:$36 sps:$4 sm:$0xff]  }
  0xcc   : > { %1787 = vmatmul.mubr.bf16.gmra.mrb[40].mxu0 %v3588_v39  ;;  %1916 = vmatmul.mubr.bf16.gmra.mrb[40].mxu1 %v3589_v40  ;;  %v3685_v39 = vld [vmem:[%s4072_s26 + $0xf0] ss:$36 sps:$4 sm:$0xff]  }
  0xcd   : > { %1794 = vmatprep.mubr.bf16.mxu0 %v3592_v43  ;;  %1923 = vmatprep.mubr.bf16.mxu1 %v3594_v44  ;;  %v3686_v40 = vld [vmem:[%s4072_s26 + $0x374] ss:$36 sps:$4 sm:$0xff]   ;;  %v3693_v44 = vld [vmem:[%s4072_s26 + $0x3bc] ss:$36 sps:$4 sm:$0xff]  }
  0xce   : > { %v3691_v43 = vld [vmem:[%s4072_s26 + $0x138] ss:$36 sps:$4 sm:$0xff]  }
  0xd4   : > { %1795 = vmatmul.mubr.bf16.gmra.mrb[44].mxu0 %v3596_v45  ;;  %1924 = vmatmul.mubr.bf16.gmra.mrb[44].mxu1 %v3597_v46  ;;  %v3695_v45 = vld [vmem:[%s4072_s26 + $0x184] ss:$36 sps:$4 sm:$0xff]   ;;  %v3697_v46 = vld [vmem:[%s4072_s26 + $0x3b8] ss:$36 sps:$4 sm:$0xff]  }
  0xd5   : > { %1931 = vmatprep.mubr.bf16.mxu1 %v3600_v49  ;;  %2028 = vmatprep.mubr.bf16.mxu0 %v3604_v50  ;;  %v3701_v49 = vld [vmem:[%s4072_s26 + $0x1cc] ss:$36 sps:$4 sm:$0xff]   ;;  %v3703_v50 = vld [vmem:[%s4072_s26 + $0x400] ss:$36 sps:$4 sm:$0xff]  }
  0xdc   : > { %1932 = vmatmul.mubr.bf16.gmra.mrb[48].mxu1 %v3605_v52  ;;  %2029 = vmatmul.mubr.bf16.vlgmr.msra.gmra.mrb[48].mxu0 %v3602_v51  ;;  %v3704_v51 = vld [vmem:[%s4072_s26 + $0x1c8] ss:$36 sps:$4 sm:$0xff]  }
  0xdd   : > { %3327 = vmatpush3.bf16.msra.mxu0 %v3608_v29  ;;  %1939 = vmatprep.mubr.bf16.mxu1 %v3609_v53  ;;  %v3669_v29 = vld [vmem:[%s4072_s26 + $0x64] ss:$36 sps:$4 sm:$0xff]   ;;  %v3706_v52 = vld [vmem:[%s4072_s26 + $0x44c] ss:$36 sps:$4 sm:$0xff]   ;;  %v3708_v53 = vld [vmem:[%s4072_s26 + $0x214] ss:$36 sps:$4 sm:$0xff]  }
  0xde   : > { %2036 = vmatprep.mubr.bf16.mxu0 %v3611_v54  ;;  %3328 = vmatprep.subr.bf16.mxu0 %v3623_v55 }
  0xe1   : > { %3329 = vmatpush3.bf16.msra.mxu0 %v3623_v55 }
  0xe2   : > { %3330 = vmatprep.subr.bf16.mxu0 %v3638_v56 }
  0xe4   : > { %1940 = vmatmul.mubr.bf16.gmra.mrb[52].mxu1 %v3613_v57  ;;  %2037 = vmatmul.mubr.bf16.gmra.mrb[52].mxu0 %v3614_v58  ;;  %v3710_v58 = vld [vmem:[%s4072_s26 + $0x448] ss:$36 sps:$4 sm:$0xff]  }
  0xe5   : > { %1947 = vmatprep.mubr.bf16.mxu1 %v3615_v59  ;;  %2044 = vmatprep.mubr.bf16.mxu0 %v3617_v60  ;;  %v3711_v59 = vld [vmem:[%s4072_s26 + $0x210] ss:$36 sps:$4 sm:$0xff]  }
  0xe6   : > { %3331 = vmatpush3.bf16.msra.mxu0 %v3638_v56 }
  0xe7   : > { %3332 = vmatprep.subr.bf16.mxu0 %v3653_v61 }
  0xea   : > { %3333 = vmatpush3.bf16.msra.mxu0 %v3653_v61 }
  0xeb   : > { %3334 = vmatprep.subr.bf16.mxu0 %v3666_v62 }
  0xec   : > { %1948 = vmatmul.mubr.bf16.gmra.mrb[56].mxu1 %v3619_v63  ;;  %2045 = vmatmul.mubr.bf16.gmra.mrb[56].mxu0 %v3620_v0  ;;  %v3712_v0 = vld [vmem:[%s4072_s26 + $0x25c] ss:$36 sps:$4 sm:$0xff]  }
  0xed   : > { %1955 = vmatprep.mubr.bf16.mxu1 %v3624_v1  ;;  %2052 = vmatprep.mubr.bf16.mxu0 %v3626_v2  ;;  %v3714_v1 = vld [vmem:[%s4072_s26 + $0x20] ss:$36 sps:$4 sm:$0xff]  }
  0xee   : > { %3335 = vmatpush3.bf16.msra.mxu0 %v3666_v62 }
  0xef   : > { %3336 = vmatprep.subr.bf16.mxu0 %v3679_v3 }
  0xf2   : > { %3337 = vmatpush3.bf16.msra.mxu0 %v3679_v3 }
  0xf3   : > { %3338 = vmatprep.subr.bf16.mxu0 %v3692_v6 }
  0xf4   : > { %1956 = vmatmul.mubr.bf16.gmra.mrb[60].mxu1 %v3628_v4  ;;  %2053 = vmatmul.mubr.bf16.gmra.mrb[60].mxu0 %v3629_v5 }
  0xf5   : > { %1963 = vmatprep.mubr.bf16.mxu1 %v3630_v7  ;;  %2060 = vmatprep.mubr.bf16.mxu0 %v3632_v8 }
  0xf6   : > { %3339 = vmatpush3.bf16.msra.mxu0 %v3692_v6 }
  0xf7   : > { %3340 = vmatprep.subr.bf16.mxu0 %v3705_v9 }
  0xfa   : > { %3341 = vmatpush3.bf16.msra.mxu0 %v3705_v9 }
  0xfc   : > { %1964 = vmatmul.mubr.bf16.gmra.mrb[64].mxu1 %v3634_v10  ;;  %2061 = vmatmul.mubr.bf16.gmra.mrb[64].mxu0 %v3635_v11  ;;  %v3715_v10 = vld [vmem:[%s4072_s26 + $0x258] ss:$36 sps:$4 sm:$0xff]   ;;  %v3716_v11 = vld [vmem:[%s4072_s26 + $0x68] ss:$36 sps:$4 sm:$0xff]  }
  0xfd   : > { %1971 = vmatprep.mubr.bf16.mxu1 %v3639_v12  ;;  %2068 = vmatprep.mubr.bf16.mxu0 %v3641_v13 }
 0x104   : > { %1972 = vmatmul.mubr.bf16.gmra.mrb[68].mxu1 %v3643_v14  ;;  %2069 = vmatmul.mubr.bf16.gmra.mrb[68].mxu0 %v3644_v15 }
 0x105   : > { %1979 = vmatprep.mubr.bf16.mxu1 %v3645_v16  ;;  %2076 = vmatprep.mubr.bf16.mxu0 %v3647_v17  ;;  %v3717_v16 = vld [vmem:[%s4072_s26 + $0x2a4] ss:$36 sps:$4 sm:$0xff]   ;;  %v3719_v17 = vld [vmem:[%s4072_s26 + $0xb0] ss:$36 sps:$4 sm:$0xff]  }
 0x10c   : > { %1980 = vmatmul.mubr.bf16.gmra.mrb[72].mxu1 %v3649_v18  ;;  %2077 = vmatmul.mubr.bf16.gmra.mrb[72].mxu0 %v3650_v19 }
 0x10d   : > { %1987 = vmatprep.mubr.bf16.mxu1 %v3654_v20  ;;  %2084 = vmatprep.mubr.bf16.mxu0 %v3656_v21 }
 0x114   : > { %1988 = vmatmul.mubr.bf16.gmra.mrb[76].mxu1 %v3658_v22  ;;  %2085 = vmatmul.mubr.bf16.gmra.mrb[76].mxu0 %v3659_v23 }
 0x115   : > { %2092 = vmatprep.mubr.bf16.mxu0 %v3660_v24  ;;  %2189 = vmatprep.mubr.bf16.mxu1 %v3664_v25 }
 0x11c   : > { %2093 = vmatmul.mubr.bf16.gmra.mrb[80].mxu0 %v3665_v27  ;;  %2190 = vmatmul.mubr.bf16.vlgmr.msra.gmra.mrb[80].mxu1 %v3662_v26  ;;  %v3720_v26 = vld [vmem:[%s4072_s26 + $0x2a0] ss:$36 sps:$4 sm:$0xff]   ;;  %v3721_v27 = vld [vmem:[%s4072_s26 + $0xf8] ss:$36 sps:$4 sm:$0xff]  }
 0x11d   : > { %2100 = vmatprep.mubr.bf16.mxu0 %v3667_v28  ;;  %2197 = vmatprep.mubr.bf16.mxu1 %v3669_v29 }
 0x124   : > { %2101 = vmatmul.mubr.bf16.gmra.mrb[84].mxu0 %v3671_v30  ;;  %2198 = vmatmul.mubr.bf16.gmra.mrb[84].mxu1 %v3672_v31 }
 0x125   : > { %2108 = vmatprep.mubr.bf16.mxu0 %v3673_v32  ;;  %2205 = vmatprep.mubr.bf16.mxu1 %v3675_v33  ;;  %v3722_v32 = vld [vmem:[%s4072_s26 + $0x2ec] ss:$36 sps:$4 sm:$0xff]   ;;  %v3724_v33 = vld [vmem:[%s4072_s26 + $0x140] ss:$36 sps:$4 sm:$0xff]  }
 0x12c   : > { %2109 = vmatmul.mubr.bf16.gmra.mrb[88].mxu0 %v3677_v34  ;;  %2206 = vmatmul.mubr.bf16.gmra.mrb[88].mxu1 %v3678_v35 }
 0x12d   : > { %2116 = vmatprep.mubr.bf16.mxu0 %v3680_v36  ;;  %2213 = vmatprep.mubr.bf16.mxu1 %v3682_v37 }
 0x134   : > { %2117 = vmatmul.mubr.bf16.gmra.mrb[92].mxu0 %v3684_v38  ;;  %2214 = vmatmul.mubr.bf16.gmra.mrb[92].mxu1 %v3685_v39 }
 0x135   : > { %2124 = vmatprep.mubr.bf16.mxu0 %v3686_v40  ;;  %2221 = vmatprep.mubr.bf16.mxu1 %v3688_v41 }
 0x13c   : > { %2125 = vmatmul.mubr.bf16.gmra.mrb[96].mxu0 %v3690_v42  ;;  %2222 = vmatmul.mubr.bf16.gmra.mrb[96].mxu1 %v3691_v43  ;;  %v3725_v42 = vld [vmem:[%s4072_s26 + $0x2e8] ss:$36 sps:$4 sm:$0xff]  }
 0x13d   : > { %2132 = vmatprep.mubr.bf16.mxu0 %v3693_v44  ;;  %2229 = vmatprep.mubr.bf16.mxu1 %v3695_v45  ;;  %v3726_v43 = vld [vmem:[%s4072_s26 + $0x188] ss:$36 sps:$4 sm:$0xff]  }
 0x144   : > { %2133 = vmatmul.mubr.bf16.gmra.mrb[100].mxu0 %v3697_v46  ;;  %2230 = vmatmul.mubr.bf16.gmra.mrb[100].mxu1 %v3698_v47 }
 0x145   : > { %2140 = vmatprep.mubr.bf16.mxu0 %v3699_v48  ;;  %2237 = vmatprep.mubr.bf16.mxu1 %v3701_v49  ;;  %v3727_v48 = vld [vmem:[%s4072_s26 + $0x334] ss:$36 sps:$4 sm:$0xff]  }
 0x146   : > { %v3729_v49 = vld [vmem:[%s4072_s26 + $0x1d0] ss:$36 sps:$4 sm:$0xff]  }
 0x14c   : > { %2141 = vmatmul.mubr.bf16.gmra.mrb[104].mxu0 %v3703_v50  ;;  %2238 = vmatmul.mubr.bf16.gmra.mrb[104].mxu1 %v3704_v51 }
 0x14d   : > { %2148 = vmatprep.mubr.bf16.mxu0 %v3706_v52  ;;  %2245 = vmatprep.mubr.bf16.mxu1 %v3708_v53 }
 0x14f   : > { %v2942_v54 = vpop.f32.mrb[0].mxu1  ;;  %v2870_v55 = vpop.f32.mrb[0].mxu0 }
 0x150   : > { %v2943_v56 = vpop.f32.mrb[1].mxu1  ;;  %v2871_v57 = vpop.f32.mrb[1].mxu0 }
 0x151   : > { %v4194_v60 = vadd.f32 %v2943_v56, %v2942_v54  ;;  %v2945_v61 = vpop.f32.mrb[2].mxu1  ;;  %v4196_v62 = vadd.f32 %v2871_v57, %v2870_v55  ;;  %v2873_v63 = vpop.f32.mrb[2].mxu0 }
 0x152   : > { %v2946_v2 = vpop.f32.mrb[3].mxu1  ;;  %v2874_v3 = vpop.f32.mrb[3].mxu0 }
 0x153   : > { %v4200_v4 = vadd.f32 %v2946_v2, %v2945_v61  ;;  %v4202_v5 = vadd.f32 %v2874_v3, %v2873_v63  ;;  %v3732_v2 = vld [vmem:[%s4072_s26 + $0x37c] ss:$36 sps:$4 sm:$0xff]  }
 0x154   : > { %2149 = vmatmul.mubr.bf16.gmra.mrb[108].mxu0 %v3710_v58  ;;  %2246 = vmatmul.mubr.bf16.gmra.mrb[108].mxu1 %v3711_v59  ;;  %v3730_v58 = vld [vmem:[%s4072_s26 + $0x330] ss:$36 sps:$4 sm:$0xff]   ;;  %v3731_v59 = vld [vmem:[%s4072_s26 + $0x218] ss:$36 sps:$4 sm:$0xff]   ;;  %v3734_v3 = vld [vmem:[%s4072_s26 + $0x260] ss:$36 sps:$4 sm:$0xff]  }
 0x155   : > { %2253 = vmatprep.mubr.bf16.mxu1 %v3712_v0  ;;  %3342 = vmatprep.mubr.bf16.mxu0 %v3714_v1 }
 0x157   : > { %v2948_v6 = vpop.f32.mrb[4].mxu1  ;;  %v2876_v7 = vpop.f32.mrb[4].mxu0 }
 0x158   : > { %v2949_v8 = vpop.f32.mrb[5].mxu1  ;;  %v2877_v9 = vpop.f32.mrb[5].mxu0 }
 0x159   : > { %v4206_v12 = vadd.f32 %v2949_v8, %v2948_v6  ;;  %v2951_v13 = vpop.f32.mrb[6].mxu1  ;;  %v4208_v14 = vadd.f32 %v2877_v9, %v2876_v7  ;;  %v2879_v15 = vpop.f32.mrb[6].mxu0 }
 0x15a   : > { %v2952_v18 = vpop.f32.mrb[7].mxu1  ;;  %v2880_v19 = vpop.f32.mrb[7].mxu0 }
 0x15b   : > { %v4212_v20 = vadd.f32 %v2952_v18, %v2951_v13  ;;  %v4214_v21 = vadd.f32 %v2880_v19, %v2879_v15  ;;  %v3735_v18 = vld [vmem:[%s4072_s26 + $0x378] ss:$36 sps:$4 sm:$0xff]   ;;  %v3736_v19 = vld [vmem:[%s4072_s26 + $0x2a8] ss:$36 sps:$4 sm:$0xff]  }
 0x15c   : > { %2254 = vmatmul.mubr.bf16.gmra.mrb[112].mxu1 %v3715_v10  ;;  %3343 = vmatmul.mubr.bf16.vlgmr.msra.gmra.mrb[112].mxu0 %v3716_v11 }
 0x15d   : > { %2261 = vmatprep.mubr.bf16.mxu1 %v3717_v16  ;;  %3346 = vmatprep.mubr.bf16.mxu0 %v3719_v17 }
 0x15f   : > { %v2954_v22 = vpop.f32.mrb[8].mxu1  ;;  %v2882_v23 = vpop.f32.mrb[8].mxu0 }
 0x160   : > { %v2955_v24 = vpop.f32.mrb[9].mxu1  ;;  %v2883_v25 = vpop.f32.mrb[9].mxu0 }
 0x161   : > { %v4218_v28 = vadd.f32 %v2955_v24, %v2954_v22  ;;  %v2957_v29 = vpop.f32.mrb[10].mxu1  ;;  %v4220_v30 = vadd.f32 %v2883_v25, %v2882_v23  ;;  %v2885_v31 = vpop.f32.mrb[10].mxu0  ;;  %v3737_v25 = vld [vmem:[%s4072_s26 + $0x3c4] ss:$36 sps:$4 sm:$0xff]  }
 0x162   : > { %v2958_v34 = vpop.f32.mrb[11].mxu1  ;;  %v2886_v35 = vpop.f32.mrb[11].mxu0 }
 0x163   : > { %v4224_v36 = vadd.f32 %v2958_v34, %v2957_v29  ;;  %v4226_v37 = vadd.f32 %v2886_v35, %v2885_v31 }
 0x164   : > { %2262 = vmatmul.mubr.bf16.gmra.mrb[116].mxu1 %v3720_v26  ;;  %3347 = vmatmul.mubr.bf16.gmra.mrb[116].mxu0 %v3721_v27  ;;  %v3739_v26 = vld [vmem:[%s4072_s26 + $0x2f0] ss:$36 sps:$4 sm:$0xff]  }
 0x165   : > { %2269 = vmatprep.mubr.bf16.mxu1 %v3722_v32  ;;  %3350 = vmatprep.mubr.bf16.mxu0 %v3724_v33 }
 0x167   : > { %v2960_v38 = vpop.f32.mrb[12].mxu1  ;;  %v2888_v39 = vpop.f32.mrb[12].mxu0 }
 0x168   : > { %v2961_v40 = vpop.f32.mrb[13].mxu1  ;;  %v2889_v41 = vpop.f32.mrb[13].mxu0 }
 0x169   : > { %v4230_v44 = vadd.f32 %v2961_v40, %v2960_v38  ;;  %v2963_v45 = vpop.f32.mrb[14].mxu1  ;;  %v4232_v46 = vadd.f32 %v2889_v41, %v2888_v39  ;;  %v2891_v47 = vpop.f32.mrb[14].mxu0  ;;  %v3740_v40 = vld [vmem:[%s4072_s26 + $0x3c0] ss:$36 sps:$4 sm:$0xff]   ;;  %v3741_v41 = vld [vmem:[%s4072_s26 + $0x338] ss:$36 sps:$4 sm:$0xff]  }
 0x16a   : > { %v2964_v50 = vpop.f32.mrb[15].mxu1  ;;  %v2892_v51 = vpop.f32.mrb[15].mxu0 }
 0x16b   : > { %v4236_v52 = vadd.f32 %v2964_v50, %v2963_v45  ;;  %v4238_v53 = vadd.f32 %v2892_v51, %v2891_v47  ;;  %v3742_v47 = vld [vmem:[%s4072_s26 + $0x40c] ss:$36 sps:$4 sm:$0xff]  }
 0x16c   : > { %2270 = vmatmul.mubr.bf16.gmra.mrb[120].mxu1 %v3725_v42  ;;  %3351 = vmatmul.mubr.bf16.gmra.mrb[120].mxu0 %v3726_v43 }
 0x16d   : > { %2277 = vmatprep.mubr.bf16.mxu1 %v3727_v48  ;;  %3354 = vmatprep.mubr.bf16.mxu0 %v3729_v49  ;;  %v3744_v48 = vld [vmem:[%s4072_s26 + $0x380] ss:$36 sps:$4 sm:$0xff]  }
 0x16f   : > { %v2982_v54 = vpop.f32.mrb[16].mxu1  ;;  %v2894_v55 = vpop.f32.mrb[16].mxu0 }
 0x170   : > { %v2983_v56 = vpop.f32.mrb[17].mxu1  ;;  %v2895_v57 = vpop.f32.mrb[17].mxu0 }
 0x171   : > { %v2984_v61 = vadd.f32 %v2983_v56, %v2982_v54  ;;  %v2985_v63 = vpop.f32.mrb[18].mxu1  ;;  %v4242_v0 = vadd.f32 %v2895_v57, %v2894_v55  ;;  %v2897_v1 = vpop.f32.mrb[18].mxu0 }
 0x172   : > { %v2986_v6 = vpop.f32.mrb[19].mxu1  ;;  %v2898_v7 = vpop.f32.mrb[19].mxu0 }
 0x173   : > { %v4247_v8 = vadd.f32 %v2984_v61, %v4196_v62  ;;  %v2987_v9 = vadd.f32 %v2986_v6, %v2985_v63  ;;  %v4249_v10 = vadd.f32 %v2898_v7, %v2897_v1  ;;  %v3745_v61 = vld [vmem:[%s4072_s26 + $0x408] ss:$36 sps:$4 sm:$0xff]   ;;  %v3747_v6 = vld [vmem:[%s4072_s26 + $0x454] ss:$36 sps:$4 sm:$0xff]  }
 0x174   : > { %2278 = vmatmul.mubr.bf16.gmra.mrb[124].mxu1 %v3730_v58  ;;  %3355 = vmatmul.mubr.bf16.gmra.mrb[124].mxu0 %v3731_v59  ;;  %v3746_v63 = vld [vmem:[%s4072_s26 + $0x3c8] ss:$36 sps:$4 sm:$0xff]   ;;  %v3749_v7 = vld [vmem:[%s4072_s26 + $0x410] ss:$36 sps:$4 sm:$0xff]  }
 0x175   : > { %v4252_v11 = vadd.f32 %v2987_v9, %v4202_v5  ;;  %2285 = vmatprep.mubr.bf16.mxu1 %v3732_v2  ;;  %3358 = vmatprep.mubr.bf16.mxu0 %v3734_v3 }
 0x177   : > { %v2988_v13 = vpop.f32.mrb[20].mxu1  ;;  %v2900_v15 = vpop.f32.mrb[20].mxu0 }
 0x178   : > { %v2989_v16 = vpop.f32.mrb[21].mxu1  ;;  %v2901_v17 = vpop.f32.mrb[21].mxu0 }
 0x179   : > { %v2990_v62 = vadd.f32 %v2989_v16, %v2988_v13  ;;  %v2991_v22 = vpop.f32.mrb[22].mxu1  ;;  %v4256_v23 = vadd.f32 %v2901_v17, %v2900_v15  ;;  %v2903_v24 = vpop.f32.mrb[22].mxu0 }
 0x17a   : > { %v2992_v27 = vpop.f32.mrb[23].mxu1  ;;  %v2904_v5 = vpop.f32.mrb[23].mxu0 }
 0x17b   : > { %v4261_v29 = vadd.f32 %v2990_v62, %v4208_v14  ;;  %v2993_v31 = vadd.f32 %v2992_v27, %v2991_v22  ;;  %v4263_v32 = vadd.f32 %v2904_v5, %v2903_v24  ;;  %v3750_v24 = vld [vmem:[%s4072_s26 + $0x450] ss:$36 sps:$4 sm:$0xff]  }
 0x17c   : > { %2286 = vmatmul.mubr.bf16.gmra.mrb[128].mxu1 %v3735_v18  ;;  %3359 = vmatmul.mubr.bf16.gmra.mrb[128].mxu0 %v3736_v19 }
 0x17d   : > { %v4266_v33 = vadd.f32 %v2993_v31, %v4214_v21  ;;  %2293 = vmatprep.mubr.bf16.mxu1 %v3737_v25  ;;  %3362 = vmatprep.mubr.bf16.mxu0 %v3739_v26  ;;  %v3751_v25 = vld [vmem:[%s4072_s26 + $0x458] ss:$36 sps:$4 sm:$0xff]  }
 0x17f   : > { %v2994_v34 = vpop.f32.mrb[24].mxu1  ;;  %v2906_v35 = vpop.f32.mrb[24].mxu0 }
 0x180   : > { %v2995_v38 = vpop.f32.mrb[25].mxu1  ;;  %v2907_v39 = vpop.f32.mrb[25].mxu0 }
 0x181   : > { %v2996_v14 = vadd.f32 %v2995_v38, %v2994_v34  ;;  %v2997_v42 = vpop.f32.mrb[26].mxu1  ;;  %v4270_v43 = vadd.f32 %v2907_v39, %v2906_v35  ;;  %v2909_v45 = vpop.f32.mrb[26].mxu0 }
 0x182   : > { %v2998_v49 = vpop.f32.mrb[27].mxu1  ;;  %v2910_v21 = vpop.f32.mrb[27].mxu0 }
 0x183   : > { %v4275_v50 = vadd.f32 %v2996_v14, %v4220_v30  ;;  %v2999_v51 = vadd.f32 %v2998_v49, %v2997_v42  ;;  %v4277_v54 = vadd.f32 %v2910_v21, %v2909_v45 }
 0x184   : > { %2294 = vmatmul.mubr.bf16.gmra.mrb[132].mxu1 %v3740_v40  ;;  %3363 = vmatmul.mubr.bf16.gmra.mrb[132].mxu0 %v3741_v41 }
 0x185   : > { %v4280_v55 = vadd.f32 %v2999_v51, %v4226_v37  ;;  %2301 = vmatprep.mubr.bf16.mxu1 %v3742_v47  ;;  %3366 = vmatprep.mubr.bf16.mxu0 %v3744_v48 }
 0x187   : > { %v3000_v56 = vpop.f32.mrb[28].mxu1  ;;  %v2912_v57 = vpop.f32.mrb[28].mxu0 }
 0x188   : > { %v3001_v58 = vpop.f32.mrb[29].mxu1  ;;  %v2913_v59 = vpop.f32.mrb[29].mxu0 }
 0x189   : > { %v3002_v30 = vadd.f32 %v3001_v58, %v3000_v56  ;;  %v3003_v1 = vpop.f32.mrb[30].mxu1  ;;  %v4284_v2 = vadd.f32 %v2913_v59, %v2912_v57  ;;  %v2915_v3 = vpop.f32.mrb[30].mxu0 }
 0x18a   : > { %v3004_v9 = vpop.f32.mrb[31].mxu1  ;;  %v2916_v37 = vpop.f32.mrb[31].mxu0 }
 0x18b   : > { %v4289_v13 = vadd.f32 %v3002_v30, %v4232_v46  ;;  %v3005_v15 = vadd.f32 %v3004_v9, %v3003_v1  ;;  %v4291_v16 = vadd.f32 %v2916_v37, %v2915_v3 }
 0x18c   : > { %2302 = vmatmul.mubr.bf16.gmra.mrb[136].mxu1 %v3745_v61  ;;  %3367 = vmatmul.mubr.bf16.gmra.mrb[136].mxu0 %v3746_v63 }
 0x18d   : > { %v4294_v17 = vadd.f32 %v3005_v15, %v4238_v53  ;;  %2309 = vmatprep.mubr.bf16.mxu1 %v3747_v6  ;;  %3370 = vmatprep.mubr.bf16.mxu0 %v3749_v7 }
 0x18f   : > { %v3006_v18 = vpop.f32.mrb[32].mxu1  ;;  %v2918_v19 = vpop.f32.mrb[32].mxu0 }
 0x190   : > { %v3007_v62 = vpop.f32.mrb[33].mxu1  ;;  %v2919_v22 = vpop.f32.mrb[33].mxu0 }
 0x191   : > { %v3008_v26 = vadd.f32 %v3007_v62, %v3006_v18  ;;  %v3009_v27 = vpop.f32.mrb[34].mxu1  ;;  %v2920_v46 = vadd.f32 %v2919_v22, %v2918_v19  ;;  %v2921_v5 = vpop.f32.mrb[34].mxu0 }
 0x192   : > { %v3010_v31 = vpop.f32.mrb[35].mxu1  ;;  %v2922_v34 = vpop.f32.mrb[35].mxu0 }
 0x193   : > { %v4299_v35 = vadd.f32 %v3008_v26, %v4242_v0  ;;  %v3011_v38 = vadd.f32 %v3010_v31, %v3009_v27  ;;  %v2923_v53 = vadd.f32 %v2922_v34, %v2921_v5 }
 0x194   : > { %2310 = vmatmul.mubr.bf16.gmra.mrb[140].mxu1 %v3750_v24  ;;  %3371 = vmatmul.mubr.bf16.gmra.mrb[140].mxu0 %v3751_v25 }
 0x195   : > { %v4302_v39 = vadd.f32 %v3011_v38, %v4249_v10 }
 0x197   : > { %v3012_v40 = vpop.f32.mrb[36].mxu1  ;;  %v2924_v41 = vpop.f32.mrb[36].mxu0 }
 0x198   : > { %v3013_v14 = vpop.f32.mrb[37].mxu1  ;;  %v2925_v42 = vpop.f32.mrb[37].mxu0 }
 0x199   : > { %v3014_v45 = vadd.f32 %v3013_v14, %v3012_v40  ;;  %v3015_v47 = vpop.f32.mrb[38].mxu1  ;;  %v2926_v48 = vadd.f32 %v2925_v42, %v2924_v41  ;;  %v2927_v49 = vpop.f32.mrb[38].mxu0 }
 0x19a   : > { %v3016_v21 = vpop.f32.mrb[39].mxu1  ;;  %v2928_v51 = vpop.f32.mrb[39].mxu0 }
 0x19b   : > { %v4305_v0 = vadd.f32 %v3014_v45, %v4256_v23  ;;  %v3017_v56 = vadd.f32 %v3016_v21, %v3015_v47  ;;  %v2929_v57 = vadd.f32 %v2928_v51, %v2927_v49 }
 0x19d   : > { %v4308_v58 = vadd.f32 %v3017_v56, %v4263_v32 }
 0x19f   : > { %v3018_v10 = vpop.f32.mrb[40].mxu1  ;;  %v2930_v59 = vpop.f32.mrb[40].mxu0 }
 0x1a0   : > { %v3019_v61 = vpop.f32.mrb[41].mxu1  ;;  %v2931_v63 = vpop.f32.mrb[41].mxu0 }
 0x1a1   : > { %v3020_v30 = vadd.f32 %v3019_v61, %v3018_v10  ;;  %v3021_v1 = vpop.f32.mrb[42].mxu1  ;;  %v4310_v3 = vadd.f32 %v2931_v63, %v2930_v59  ;;  %v2933_v6 = vpop.f32.mrb[42].mxu0 }
 0x1a2   : > { %v3022_v7 = vpop.f32.mrb[43].mxu1  ;;  %v2934_v9 = vpop.f32.mrb[43].mxu0 }
 0x1a3   : > { %v4313_v37 = vadd.f32 %v3020_v30, %v4270_v43  ;;  %v3023_v23 = vadd.f32 %v3022_v7, %v3021_v1  ;;  %v2935_v15 = vadd.f32 %v2934_v9, %v2933_v6 }
 0x1a5   : > { %v4316_v18 = vadd.f32 %v3023_v23, %v4277_v54 }
 0x1a7   : > { %v3024_v32 = vpop.f32.mrb[44].mxu1  ;;  %v2936_v19 = vpop.f32.mrb[44].mxu0 }
 0x1a8   : > { %v3025_v62 = vpop.f32.mrb[45].mxu1  ;;  %v2937_v22 = vpop.f32.mrb[45].mxu0 }
 0x1a9   : > { %v3026_v24 = vadd.f32 %v3025_v62, %v3024_v32  ;;  %v3027_v25 = vpop.f32.mrb[46].mxu1  ;;  %v4318_v26 = vadd.f32 %v2937_v22, %v2936_v19  ;;  %v2939_v27 = vpop.f32.mrb[46].mxu0 }
 0x1aa   : > { %v3028_v5 = vpop.f32.mrb[47].mxu1  ;;  %v2940_v31 = vpop.f32.mrb[47].mxu0 }
 0x1ab   : > { %v4321_v34 = vadd.f32 %v3026_v24, %v4284_v2  ;;  %v3029_v43 = vadd.f32 %v3028_v5, %v3027_v25  ;;  %v4323_v38 = vadd.f32 %v2940_v31, %v2939_v27 }
 0x1ad   : > { %v4326_v54 = vadd.f32 %v3029_v43, %v4291_v16 }
 0x1af   : > { %v3030_v40 = vpop.f32.mrb[48].mxu1  ;;  %v3094_v41 = vpop.f32.mrb[48].mxu0 }
 0x1b0   : > { %v3031_v14 = vpop.f32.mrb[49].mxu1  ;;  %v3095_v42 = vpop.f32.mrb[49].mxu0 }
 0x1b1   : > { %v3032_v45 = vadd.f32 %v3031_v14, %v3030_v40  ;;  %v3096_v47 = vadd.f32 %v3095_v42, %v3094_v41  ;;  %v3033_v49 = vpop.f32.mrb[50].mxu1  ;;  %v3097_v21 = vpop.f32.mrb[50].mxu0 }
 0x1b2   : > { %v3034_v51 = vpop.f32.mrb[51].mxu1  ;;  %v3098_v56 = vpop.f32.mrb[51].mxu0 }
 0x1b3   : > { %v4328_v10 = vadd.f32 %v3032_v45, %v2920_v46  ;;  %v4331_v2 = vadd.f32 %v3096_v47, %v4247_v8  ;;  %v3035_v59 = vadd.f32 %v3034_v51, %v3033_v49  ;;  %v3099_v61 = vadd.f32 %v3098_v56, %v3097_v21 }
 0x1b5   : > { %v4333_v63 = vadd.f32 %v3035_v59, %v2923_v53  ;;  %v4336_v16 = vadd.f32 %v3099_v61, %v4252_v11 }
 0x1b7   : > { %v3036_v30 = vpop.f32.mrb[52].mxu1  ;;  %v3100_v1 = vpop.f32.mrb[52].mxu0 }
 0x1b8   : > { %v3037_v6 = vpop.f32.mrb[53].mxu1  ;;  %v3101_v7 = vpop.f32.mrb[53].mxu0 }
 0x1b9   : > { %v3038_v9 = vadd.f32 %v3037_v6, %v3036_v30  ;;  %v3102_v23 = vadd.f32 %v3101_v7, %v3100_v1  ;;  %v3039_v32 = vpop.f32.mrb[54].mxu1  ;;  %v3103_v19 = vpop.f32.mrb[54].mxu0 }
 0x1ba   : > { %v3040_v46 = vpop.f32.mrb[55].mxu1  ;;  %v3104_v62 = vpop.f32.mrb[55].mxu0 }
 0x1bb   : > { %v4338_v22 = vadd.f32 %v3038_v9, %v2926_v48  ;;  %v4341_v8 = vadd.f32 %v3102_v23, %v4261_v29  ;;  %v3041_v53 = vadd.f32 %v3040_v46, %v3039_v32  ;;  %v3105_v24 = vadd.f32 %v3104_v62, %v3103_v19 }
 0x1bd   : > { %v4343_v25 = vadd.f32 %v3041_v53, %v2929_v57  ;;  %v4346_v11 = vadd.f32 %v3105_v24, %v4266_v33 }
 0x1bf   : > { %v3042_v27 = vpop.f32.mrb[56].mxu1  ;;  %v3106_v5 = vpop.f32.mrb[56].mxu0 }
 0x1c0   : > { %v3043_v31 = vpop.f32.mrb[57].mxu1  ;;  %v3107_v43 = vpop.f32.mrb[57].mxu0 }
 0x1c1   : > { %v3044_v40 = vadd.f32 %v3043_v31, %v3042_v27  ;;  %v3108_v41 = vadd.f32 %v3107_v43, %v3106_v5  ;;  %v3045_v14 = vpop.f32.mrb[58].mxu1  ;;  %v3109_v42 = vpop.f32.mrb[58].mxu0 }
 0x1c2   : > { %v3046_v48 = vpop.f32.mrb[59].mxu1  ;;  %v3110_v45 = vpop.f32.mrb[59].mxu0 }
 0x1c3   : > { %v4349_v29 = vadd.f32 %v3044_v40, %v4310_v3  ;;  %v4352_v47 = vadd.f32 %v3108_v41, %v4275_v50  ;;  %v3047_v57 = vadd.f32 %v3046_v48, %v3045_v14  ;;  %v3111_v49 = vadd.f32 %v3110_v45, %v3109_v42 }
 0x1c5   : > { %v4354_v33 = vadd.f32 %v3047_v57, %v2935_v15  ;;  %v4357_v21 = vadd.f32 %v3111_v49, %v4280_v55 }
 0x1c7   : > { %v3048_v51 = vpop.f32.mrb[60].mxu1  ;;  %v3112_v56 = vpop.f32.mrb[60].mxu0 }
 0x1c8   : > { %v3049_v59 = vpop.f32.mrb[61].mxu1  ;;  %v3113_v61 = vpop.f32.mrb[61].mxu0 }
 0x1c9   : > { %v3050_v30 = vadd.f32 %v3049_v59, %v3048_v51  ;;  %v3114_v1 = vadd.f32 %v3113_v61, %v3112_v56  ;;  %v3051_v6 = vpop.f32.mrb[62].mxu1  ;;  %v3115_v7 = vpop.f32.mrb[62].mxu0 }
 0x1ca   : > { %v3052_v3 = vpop.f32.mrb[63].mxu1  ;;  %v3116_v9 = vpop.f32.mrb[63].mxu0 }
 0x1cb   : > { %v4360_v50 = vadd.f32 %v3050_v30, %v4318_v26  ;;  %v4363_v23 = vadd.f32 %v3114_v1, %v4289_v13  ;;  %v3053_v15 = vadd.f32 %v3052_v3, %v3051_v6  ;;  %v3117_v32 = vadd.f32 %v3116_v9, %v3115_v7 }
 0x1cd   : > { %v4366_v55 = vadd.f32 %v3053_v15, %v4323_v38  ;;  %v4369_v19 = vadd.f32 %v3117_v32, %v4294_v17 }
 0x1cf   : > { %v3054_v46 = vpop.f32.mrb[64].mxu1  ;;  %v3118_v62 = vpop.f32.mrb[64].mxu0 }
 0x1d0   : > { %v3055_v53 = vpop.f32.mrb[65].mxu1  ;;  %v3119_v24 = vpop.f32.mrb[65].mxu0 }
 0x1d1   : > { %v3056_v27 = vadd.f32 %v3055_v53, %v3054_v46  ;;  %v3120_v5 = vadd.f32 %v3119_v24, %v3118_v62  ;;  %v3057_v31 = vpop.f32.mrb[66].mxu1  ;;  %v3121_v26 = vpop.f32.mrb[66].mxu0 }
 0x1d2   : > { %v3058_v43 = vpop.f32.mrb[67].mxu1  ;;  %v3122_v40 = vpop.f32.mrb[67].mxu0 }
 0x1d3   : > { %v4372_v13 = vadd.f32 %v3056_v27, %v4194_v60  ;;  %v4375_v41 = vadd.f32 %v3120_v5, %v4299_v35  ;;  %v3059_v38 = vadd.f32 %v3058_v43, %v3057_v31  ;;  %v3123_v14 = vadd.f32 %v3122_v40, %v3121_v26 }
 0x1d5   : > { %v4378_v17 = vadd.f32 %v3059_v38, %v4200_v4  ;;  %v4381_v42 = vadd.f32 %v3123_v14, %v4302_v39 }
 0x1d7   : > { %v3060_v48 = vpop.f32.mrb[68].mxu1  ;;  %v3124_v45 = vpop.f32.mrb[68].mxu0 }
 0x1d8   : > { %v3061_v57 = vpop.f32.mrb[69].mxu1  ;;  %v3125_v49 = vpop.f32.mrb[69].mxu0 }
 0x1d9   : > { %v3062_v51 = vadd.f32 %v3061_v57, %v3060_v48  ;;  %v3126_v56 = vadd.f32 %v3125_v49, %v3124_v45  ;;  %v3063_v59 = vpop.f32.mrb[70].mxu1  ;;  %v3127_v60 = vpop.f32.mrb[70].mxu0 }
 0x1da   : > { %v3064_v61 = vpop.f32.mrb[71].mxu1  ;;  %v3128_v30 = vpop.f32.mrb[71].mxu0 }
 0x1db   : > { %v4384_v35 = vadd.f32 %v3062_v51, %v4206_v12  ;;  %v4387_v1 = vadd.f32 %v3126_v56, %v4305_v0  ;;  %v3065_v4 = vadd.f32 %v3064_v61, %v3063_v59  ;;  %v3129_v6 = vadd.f32 %v3128_v30, %v3127_v60 }
 0x1dd   : > { %v4390_v39 = vadd.f32 %v3065_v4, %v4212_v20  ;;  %v4393_v7 = vadd.f32 %v3129_v6, %v4308_v58 }
 0x1df   : > { %v3066_v3 = vpop.f32.mrb[72].mxu1  ;;  %v3130_v9 = vpop.f32.mrb[72].mxu0 }
 0x1e0   : > { %v3067_v15 = vpop.f32.mrb[73].mxu1  ;;  %v3131_v32 = vpop.f32.mrb[73].mxu0 }
 0x1e1   : > { %v3068_v46 = vadd.f32 %v3067_v15, %v3066_v3  ;;  %v3132_v62 = vadd.f32 %v3131_v32, %v3130_v9  ;;  %v3069_v53 = vpop.f32.mrb[74].mxu1  ;;  %v3133_v12 = vpop.f32.mrb[74].mxu0 }
 0x1e2   : > { %v3070_v24 = vpop.f32.mrb[75].mxu1  ;;  %v3134_v27 = vpop.f32.mrb[75].mxu0 }
 0x1e3   : > { %v4396_v0 = vadd.f32 %v3068_v46, %v4218_v28  ;;  %v4399_v5 = vadd.f32 %v3132_v62, %v4313_v37  ;;  %v3071_v20 = vadd.f32 %v3070_v24, %v3069_v53  ;;  %v3135_v31 = vadd.f32 %v3134_v27, %v3133_v12 }
 0x1e5   : > { %v4402_v58 = vadd.f32 %v3071_v20, %v4224_v36  ;;  %v4405_v26 = vadd.f32 %v3135_v31, %v4316_v18 }
 0x1e7   : > { %v3072_v43 = vpop.f32.mrb[76].mxu1  ;;  %v3136_v40 = vpop.f32.mrb[76].mxu0 }
 0x1e8   : > { %v3073_v38 = vpop.f32.mrb[77].mxu1  ;;  %v3137_v14 = vpop.f32.mrb[77].mxu0 }
 0x1e9   : > { %v3074_v48 = vadd.f32 %v3073_v38, %v3072_v43  ;;  %v3138_v45 = vadd.f32 %v3137_v14, %v3136_v40  ;;  %v3075_v57 = vpop.f32.mrb[78].mxu1  ;;  %v3139_v28 = vpop.f32.mrb[78].mxu0 }
 0x1ea   : > { %v3076_v49 = vpop.f32.mrb[79].mxu1  ;;  %v3140_v51 = vpop.f32.mrb[79].mxu0 }
 0x1eb   : > { %v4408_v37 = vadd.f32 %v3074_v48, %v4230_v44  ;;  %v4411_v56 = vadd.f32 %v3138_v45, %v4321_v34  ;;  %v3077_v36 = vadd.f32 %v3076_v49, %v3075_v57  ;;  %v3141_v59 = vadd.f32 %v3140_v51, %v3139_v28 }
 0x1ed   : > { %v4414_v18 = vadd.f32 %v3077_v36, %v4236_v52  ;;  %v4417_v60 = vadd.f32 %v3141_v59, %v4326_v54 }
 0x1ef   : > { %v3142_v61 = vpop.f32.mrb[80].mxu0  ;;  %v3206_v30 = vpop.f32.mrb[80].mxu1 }
 0x1f0   : > { %v3143_v4 = vpop.f32.mrb[81].mxu0  ;;  %v3207_v6 = vpop.f32.mrb[81].mxu1 }
 0x1f1   : > { %v3144_v3 = vadd.f32 %v3143_v4, %v3142_v61  ;;  %v3208_v9 = vadd.f32 %v3207_v6, %v3206_v30  ;;  %v3145_v15 = vpop.f32.mrb[82].mxu0  ;;  %v3209_v44 = vpop.f32.mrb[82].mxu1 }
 0x1f2   : > { %v3146_v32 = vpop.f32.mrb[83].mxu0  ;;  %v3210_v46 = vpop.f32.mrb[83].mxu1 }
 0x1f3   : > { %v4420_v34 = vadd.f32 %v3144_v3, %v4328_v10  ;;  %v3147_v62 = vadd.f32 %v3146_v32, %v3145_v15  ;;  %v3211_v53 = vadd.f32 %v3210_v46, %v3209_v44  ;;  %v4423_v52 = vadd.f32 %v3208_v9, %v4331_v2 }
 0x1f5   : > { %v4426_v54 = vadd.f32 %v3147_v62, %v4333_v63  ;;  %v4429_v12 = vadd.f32 %v3211_v53, %v4336_v16 }
 0x1f7   : > { %v3148_v24 = vpop.f32.mrb[84].mxu0  ;;  %v3212_v27 = vpop.f32.mrb[84].mxu1 }
 0x1f8   : > { %v3149_v20 = vpop.f32.mrb[85].mxu0  ;;  %v3213_v31 = vpop.f32.mrb[85].mxu1 }
 0x1f9   : > { %v3150_v43 = vadd.f32 %v3149_v20, %v3148_v24  ;;  %v3214_v40 = vadd.f32 %v3213_v31, %v3212_v27  ;;  %v3151_v38 = vpop.f32.mrb[86].mxu0  ;;  %v3215_v10 = vpop.f32.mrb[86].mxu1 }
 0x1fa   : > { %v3152_v14 = vpop.f32.mrb[87].mxu0  ;;  %v3216_v48 = vpop.f32.mrb[87].mxu1 }
 0x1fb   : > { %v4432_v45 = vadd.f32 %v3150_v43, %v4338_v22  ;;  %v3153_v2 = vadd.f32 %v3152_v14, %v3151_v38  ;;  %v3217_v57 = vadd.f32 %v3216_v48, %v3215_v10  ;;  %v4435_v63 = vadd.f32 %v3214_v40, %v4341_v8 }
 0x1fd   : > { %v4438_v16 = vadd.f32 %v3153_v2, %v4343_v25  ;;  %v4441_v28 = vadd.f32 %v3217_v57, %v4346_v11 }
 0x1ff   : > { %v3154_v49 = vpop.f32.mrb[88].mxu0  ;;  %v3218_v51 = vpop.f32.mrb[88].mxu1 }
 0x200   : > { %v3155_v36 = vpop.f32.mrb[89].mxu0  ;;  %v3219_v59 = vpop.f32.mrb[89].mxu1 }
 0x201   : > { %v3156_v61 = vadd.f32 %v3155_v36, %v3154_v49  ;;  %v3220_v30 = vadd.f32 %v3219_v59, %v3218_v51  ;;  %v3157_v4 = vpop.f32.mrb[90].mxu0  ;;  %v3221_v22 = vpop.f32.mrb[90].mxu1 }
 0x202   : > { %v3158_v6 = vpop.f32.mrb[91].mxu0  ;;  %v3222_v3 = vpop.f32.mrb[91].mxu1 }
 0x203   : > { %v4444_v9 = vadd.f32 %v3156_v61, %v4349_v29  ;;  %v3159_v8 = vadd.f32 %v3158_v6, %v3157_v4  ;;  %v3223_v15 = vadd.f32 %v3222_v3, %v3221_v22  ;;  %v4447_v25 = vadd.f32 %v3220_v30, %v4352_v47 }
 0x205   : > { %v4450_v11 = vadd.f32 %v3159_v8, %v4354_v33  ;;  %v4453_v44 = vadd.f32 %v3223_v15, %v4357_v21 }
 0x207   : > { %v3160_v32 = vpop.f32.mrb[92].mxu0  ;;  %v3224_v46 = vpop.f32.mrb[92].mxu1 }
 0x208   : > { %v3161_v62 = vpop.f32.mrb[93].mxu0  ;;  %v3225_v53 = vpop.f32.mrb[93].mxu1 }
 0x209   : > { %v3162_v24 = vadd.f32 %v3161_v62, %v3160_v32  ;;  %v3226_v27 = vadd.f32 %v3225_v53, %v3224_v46  ;;  %v3163_v20 = vpop.f32.mrb[94].mxu0  ;;  %v3227_v29 = vpop.f32.mrb[94].mxu1 }
 0x20a   : > { %v3164_v31 = vpop.f32.mrb[95].mxu0  ;;  %v3228_v43 = vpop.f32.mrb[95].mxu1 }
 0x20b   : > { %v4456_v40 = vadd.f32 %v3162_v24, %v4360_v50  ;;  %v3165_v47 = vadd.f32 %v3164_v31, %v3163_v20  ;;  %v3229_v38 = vadd.f32 %v3228_v43, %v3227_v29  ;;  %v4459_v33 = vadd.f32 %v3226_v27, %v4363_v23 }
 0x20d   : > { %v4462_v21 = vadd.f32 %v3165_v47, %v4366_v55  ;;  %v4465_v10 = vadd.f32 %v3229_v38, %v4369_v19 }
 0x20f   : > { %v3166_v14 = vpop.f32.mrb[96].mxu0  ;;  %v3230_v48 = vpop.f32.mrb[96].mxu1 }
 0x210   : > { %v3167_v2 = vpop.f32.mrb[97].mxu0  ;;  %v3231_v57 = vpop.f32.mrb[97].mxu1 }
 0x211   : > { %v3168_v49 = vadd.f32 %v3167_v2, %v3166_v14  ;;  %v3232_v51 = vadd.f32 %v3231_v57, %v3230_v48  ;;  %v3169_v36 = vpop.f32.mrb[98].mxu0  ;;  %v3233_v50 = vpop.f32.mrb[98].mxu1 }
 0x212   : > { %v3170_v59 = vpop.f32.mrb[99].mxu0  ;;  %v3234_v61 = vpop.f32.mrb[99].mxu1 }
 0x213   : > { %v4468_v30 = vadd.f32 %v3168_v49, %v4372_v13  ;;  %v3171_v23 = vadd.f32 %v3170_v59, %v3169_v36  ;;  %v3235_v4 = vadd.f32 %v3234_v61, %v3233_v50  ;;  %v4471_v55 = vadd.f32 %v3232_v51, %v4375_v41 }
 0x215   : > { %v4474_v19 = vadd.f32 %v3171_v23, %v4378_v17  ;;  %v4477_v22 = vadd.f32 %v3235_v4, %v4381_v42 }
 0x217   : > { %v3172_v6 = vpop.f32.mrb[100].mxu0  ;;  %v3236_v3 = vpop.f32.mrb[100].mxu1 }
 0x218   : > { %v3173_v8 = vpop.f32.mrb[101].mxu0  ;;  %v3237_v15 = vpop.f32.mrb[101].mxu1 }
 0x219   : > { %v3174_v32 = vadd.f32 %v3173_v8, %v3172_v6  ;;  %v3238_v46 = vadd.f32 %v3237_v15, %v3236_v3  ;;  %v3175_v62 = vpop.f32.mrb[102].mxu0  ;;  %v3239_v13 = vpop.f32.mrb[102].mxu1 }
 0x21a   : > { %v3176_v53 = vpop.f32.mrb[103].mxu0  ;;  %v3240_v24 = vpop.f32.mrb[103].mxu1 }
 0x21b   : > { %v4480_v27 = vadd.f32 %v3174_v32, %v4384_v35  ;;  %v3177_v41 = vadd.f32 %v3176_v53, %v3175_v62  ;;  %v3241_v20 = vadd.f32 %v3240_v24, %v3239_v13  ;;  %v4483_v17 = vadd.f32 %v3238_v46, %v4387_v1 }
 0x21d   : > { %v4486_v42 = vadd.f32 %v3177_v41, %v4390_v39  ;;  %v4489_v29 = vadd.f32 %v3241_v20, %v4393_v7 }
 0x21f   : > { %v3178_v31 = vpop.f32.mrb[104].mxu0  ;;  %v3242_v43 = vpop.f32.mrb[104].mxu1 }
 0x220   : > { %v3179_v47 = vpop.f32.mrb[105].mxu0  ;;  %v3243_v38 = vpop.f32.mrb[105].mxu1 }
 0x221   : > { %v3180_v14 = vadd.f32 %v3179_v47, %v3178_v31  ;;  %v3244_v48 = vadd.f32 %v3243_v38, %v3242_v43  ;;  %v3181_v2 = vpop.f32.mrb[106].mxu0  ;;  %v3245_v35 = vpop.f32.mrb[106].mxu1 }
 0x222   : > { %v3182_v57 = vpop.f32.mrb[107].mxu0  ;;  %v3246_v49 = vpop.f32.mrb[107].mxu1 }
 0x223   : > { %v4492_v51 = vadd.f32 %v3180_v14, %v4396_v0  ;;  %v3183_v1 = vadd.f32 %v3182_v57, %v3181_v2  ;;  %v3247_v36 = vadd.f32 %v3246_v49, %v3245_v35  ;;  %v4495_v39 = vadd.f32 %v3244_v48, %v4399_v5 }
 0x225   : > { %v4498_v7 = vadd.f32 %v3183_v1, %v4402_v58  ;;  %v4501_v50 = vadd.f32 %v3247_v36, %v4405_v26 }
 0x227   : > { %v3184_v59 = vpop.f32.mrb[108].mxu0  ;;  %v3248_v61 = vpop.f32.mrb[108].mxu1 }
 0x228   : > { %v3185_v23 = vpop.f32.mrb[109].mxu0  ;;  %v3249_v4 = vpop.f32.mrb[109].mxu1 }
 0x229   : > { %v3186_v6 = vadd.f32 %v3185_v23, %v3184_v59  ;;  %v3250_v3 = vadd.f32 %v3249_v4, %v3248_v61  ;;  %v3187_v0 = vpop.f32.mrb[110].mxu0  ;;  %v3251_v8 = vpop.f32.mrb[110].mxu1 }
 0x22a   : > { %v3188_v15 = vpop.f32.mrb[111].mxu0  ;;  %v3252_v32 = vpop.f32.mrb[111].mxu1 }
 0x22b   : > { %v4504_v5 = vadd.f32 %v3186_v6, %v4408_v37  ;;  %v3189_v46 = vadd.f32 %v3188_v15, %v3187_v0  ;;  %v3253_v58 = vadd.f32 %v3252_v32, %v3251_v8  ;;  %v4507_v62 = vadd.f32 %v3250_v3, %v4411_v56 }
 0x22d   : > { %v4511_v26 = vadd.f32 %v3189_v46, %v4414_v18  ;;  %v4514_v13 = vadd.f32 %v3253_v58, %v4417_v60 }
 0x22f   : > { %v3254_v53 = vpop.f32.mrb[112].mxu1  ;;  %v3344_v24 = vpop.f32.mrb[112].mxu0 }
 0x230   : > { %v2361_v41 = vadd.f32 %v3344_v24, %v4435_v63  ;;  %v3255_v20 = vpop.f32.mrb[113].mxu1  ;;  %v2352_v31 = vpop.f32.mrb[113].mxu0 }
 0x231   : > { %v3256_v37 = vadd.f32 %v3255_v20, %v3254_v53  ;;  %v2353_v43 = vadd.f32 %v2352_v31, %v4423_v52  ;;  %v3257_v47 = vpop.f32.mrb[114].mxu1  ;;  %v3345_v38 = vpop.f32.mrb[114].mxu0 }
 0x232   : > { %2481 = vst [vmem:[%s4518_s19 + $0x10] sm:$0xff] %v2361_v41  ;;  %v2364_v56 = vadd.f32 %v3345_v38, %v4441_v28  ;;  %v3258_v18 = vpop.f32.mrb[115].mxu1  ;;  %v2355_v60 = vpop.f32.mrb[115].mxu0 }
 0x233   : > { %2479 = vst [vmem:[%s4518_s19] sm:$0xff] %v2353_v43  ;;  %v3259_v63 = vadd.f32 %v3258_v18, %v3257_v47  ;;  %v2356_v14 = vadd.f32 %v2355_v60, %v4429_v12  ;;  %v4525_v52 = vadd.f32 %v3256_v37, %v4420_v34 }
 0x234   : > { %2482 = vst [vmem:[%s4518_s19 + $0x18] sm:$0xff] %v2364_v56 }
 0x235   : > { %2480 = vst [vmem:[%s4518_s19 + $0x8] sm:$0xff] %v2356_v14  ;;  %v4530_v48 = vadd.f32 %v3259_v63, %v4426_v54 }
 0x237   : > { %v3260_v2 = vpop.f32.mrb[116].mxu1  ;;  %v3348_v35 = vpop.f32.mrb[116].mxu0 }
 0x238   : > { %v2377_v28 = vadd.f32 %v3348_v35, %v4459_v33  ;;  %v3261_v57 = vpop.f32.mrb[117].mxu1  ;;  %v2368_v49 = vpop.f32.mrb[117].mxu0 }
 0x239   : > { %v3262_v1 = vadd.f32 %v3261_v57, %v3260_v2  ;;  %v2369_v12 = vadd.f32 %v2368_v49, %v4447_v25  ;;  %v3263_v36 = vpop.f32.mrb[118].mxu1  ;;  %v3349_v34 = vpop.f32.mrb[118].mxu0 }
 0x23a   : > { %2485 = vst [vmem:[%s4518_s19 + $0x30] sm:$0xff] %v2377_v28  ;;  %v2380_v59 = vadd.f32 %v3349_v34, %v4465_v10  ;;  %v3264_v61 = vpop.f32.mrb[119].mxu1  ;;  %v2371_v23 = vpop.f32.mrb[119].mxu0 }
 0x23b   : > { %2483 = vst [vmem:[%s4518_s19 + $0x20] sm:$0xff] %v2369_v12  ;;  %v3265_v54 = vadd.f32 %v3264_v61, %v3263_v36  ;;  %v2372_v4 = vadd.f32 %v2371_v23, %v4453_v44  ;;  %v2264_v33 = vadd.f32 %v3262_v1, %v4432_v45 }
 0x23c   : > { %2486 = vst [vmem:[%s4518_s19 + $0x38] sm:$0xff] %v2380_v59 }
 0x23d   : > { %2484 = vst [vmem:[%s4518_s19 + $0x28] sm:$0xff] %v2372_v4  ;;  %v2267_v6 = vadd.f32 %v3265_v54, %v4438_v16 }
 0x23f   : > { %v3266_v25 = vpop.f32.mrb[120].mxu1  ;;  %v3352_v3 = vpop.f32.mrb[120].mxu0 }
 0x240   : > { %v2393_v0 = vadd.f32 %v3352_v3, %v4483_v17  ;;  %v3267_v10 = vpop.f32.mrb[121].mxu1  ;;  %v2384_v8 = vpop.f32.mrb[121].mxu0 }
 0x241   : > { %v3268_v15 = vadd.f32 %v3267_v10, %v3266_v25  ;;  %v2385_v32 = vadd.f32 %v2384_v8, %v4471_v55  ;;  %v3269_v46 = vpop.f32.mrb[122].mxu1  ;;  %v3353_v44 = vpop.f32.mrb[122].mxu0 }
 0x242   : > { %2489 = vst [vmem:[%s4518_s19 + $0x50] sm:$0xff] %v2393_v0  ;;  %v2396_v45 = vadd.f32 %v3353_v44, %v4489_v29  ;;  %v3270_v58 = vpop.f32.mrb[123].mxu1  ;;  %v2387_v53 = vpop.f32.mrb[123].mxu0 }
 0x243   : > { %2487 = vst [vmem:[%s4518_s19 + $0x40] sm:$0xff] %v2385_v32  ;;  %v3271_v16 = vadd.f32 %v3270_v58, %v3269_v46  ;;  %v2388_v24 = vadd.f32 %v2387_v53, %v4477_v22  ;;  %v2272_v17 = vadd.f32 %v3268_v15, %v4444_v9 }
 0x244   : > { %2490 = vst [vmem:[%s4518_s19 + $0x58] sm:$0xff] %v2396_v45 }
 0x245   : > { %2488 = vst [vmem:[%s4518_s19 + $0x48] sm:$0xff] %v2388_v24  ;;  %v2275_v41 = vadd.f32 %v3271_v16, %v4450_v11 }
 0x247   : > { %v3272_v55 = vpop.f32.mrb[124].mxu1  ;;  %v3356_v20 = vpop.f32.mrb[124].mxu0 }
 0x248   : > { %v2409_v31 = vadd.f32 %v3356_v20, %v4507_v62  ;;  %v3273_v29 = vpop.f32.mrb[125].mxu1  ;;  %v2400_v37 = vpop.f32.mrb[125].mxu0 }
 0x249   : > { %v3274_v43 = vadd.f32 %v3273_v29, %v3272_v55  ;;  %v2401_v47 = vadd.f32 %v2400_v37, %v4495_v39  ;;  %v3275_v38 = vpop.f32.mrb[126].mxu1  ;;  %v3357_v22 = vpop.f32.mrb[126].mxu0 }
 0x24a   : > { %2493 = vst [vmem:[%s4518_s19 + $0x70] sm:$0xff] %v2409_v31  ;;  %v2412_v9 = vadd.f32 %v3357_v22, %v4514_v13  ;;  %v3276_v56 = vpop.f32.mrb[127].mxu1  ;;  %v2403_v18 = vpop.f32.mrb[127].mxu0 }
 0x24b   : > { %2491 = vst [vmem:[%s4518_s19 + $0x60] sm:$0xff] %v2401_v47  ;;  %v3277_v11 = vadd.f32 %v3276_v56, %v3275_v38  ;;  %v2404_v60 = vadd.f32 %v2403_v18, %v4501_v50  ;;  %v2280_v62 = vadd.f32 %v3274_v43, %v4456_v40 }
 0x24c   : > { %2494 = vst [vmem:[%s4518_s19 + $0x78] sm:$0xff] %v2412_v9 }
 0x24d   : > { %2492 = vst [vmem:[%s4518_s19 + $0x68] sm:$0xff] %v2404_v60  ;;  %v2283_v63 = vadd.f32 %v3277_v11, %v4462_v21 }
 0x24f   : > { %v3278_v39 = vpop.f32.mrb[128].mxu1  ;;  %v3360_v14 = vpop.f32.mrb[128].mxu0 }
 0x250   : > { %v2425_v2 = vadd.f32 %v3360_v14, %v2264_v33  ;;  %v3279_v13 = vpop.f32.mrb[129].mxu1  ;;  %v2416_v35 = vpop.f32.mrb[129].mxu0 }
 0x251   : > { %v3280_v28 = vadd.f32 %v3279_v13, %v3278_v39  ;;  %v2417_v57 = vadd.f32 %v2416_v35, %v4525_v52  ;;  %v3281_v49 = vpop.f32.mrb[130].mxu1  ;;  %v3361_v1 = vpop.f32.mrb[130].mxu0 }
 0x252   : > { %2497 = vst [vmem:[%s4518_s19 + $0x90] sm:$0xff] %v2425_v2  ;;  %v2428_v50 = vadd.f32 %v3361_v1, %v2267_v6  ;;  %v3282_v40 = vpop.f32.mrb[131].mxu1  ;;  %v2419_v12 = vpop.f32.mrb[131].mxu0 }
 0x253   : > { %2495 = vst [vmem:[%s4518_s19 + $0x80] sm:$0xff] %v2417_v57  ;;  %v3283_v36 = vadd.f32 %v3282_v40, %v3281_v49  ;;  %v2420_v21 = vadd.f32 %v2419_v12, %v4530_v48  ;;  %v2288_v34 = vadd.f32 %v3280_v28, %v4468_v30 }
 0x254   : > { %2498 = vst [vmem:[%s4518_s19 + $0x98] sm:$0xff] %v2428_v50 }
 0x255   : > { %2496 = vst [vmem:[%s4518_s19 + $0x88] sm:$0xff] %v2420_v21  ;;  %v2291_v59 = vadd.f32 %v3283_v36, %v4474_v19 }
 0x257   : > { %v3284_v61 = vpop.f32.mrb[132].mxu1  ;;  %v3364_v52 = vpop.f32.mrb[132].mxu0 }
 0x258   : > { %v2441_v23 = vadd.f32 %v3364_v52, %v2280_v62  ;;  %v3285_v54 = vpop.f32.mrb[133].mxu1  ;;  %v2432_v4 = vpop.f32.mrb[133].mxu0 }
 0x259   : > { %v3286_v33 = vadd.f32 %v3285_v54, %v3284_v61  ;;  %v2433_v6 = vadd.f32 %v2432_v4, %v2272_v17  ;;  %v3287_v25 = vpop.f32.mrb[134].mxu1  ;;  %v3365_v3 = vpop.f32.mrb[134].mxu0 }
 0x25a   : > { %2501 = vst [vmem:[%s4518_s19 + $0xb0] sm:$0xff] %v2441_v23  ;;  %v2444_v48 = vadd.f32 %v3365_v3, %v2283_v63  ;;  %v3288_v0 = vpop.f32.mrb[135].mxu1  ;;  %v2435_v30 = vpop.f32.mrb[135].mxu0 }
 0x25b   : > { %2499 = vst [vmem:[%s4518_s19 + $0xa0] sm:$0xff] %v2433_v6  ;;  %v3289_v10 = vadd.f32 %v3288_v0, %v3287_v25  ;;  %v2436_v8 = vadd.f32 %v2435_v30, %v2275_v41  ;;  %v2296_v19 = vadd.f32 %v3286_v33, %v4480_v27 }
 0x25c   : > { %2502 = vst [vmem:[%s4518_s19 + $0xb8] sm:$0xff] %v2444_v48 }
 0x25d   : > { %2500 = vst [vmem:[%s4518_s19 + $0xa8] sm:$0xff] %v2436_v8  ;;  %v2299_v15 = vadd.f32 %v3289_v10, %v4486_v42 }
 0x25f   : > { %v3290_v32 = vpop.f32.mrb[136].mxu1  ;;  %v3368_v46 = vpop.f32.mrb[136].mxu0 }
 0x260   : > { %v2457_v44 = vadd.f32 %v3368_v46, %v2296_v19  ;;  %v3291_v45 = vpop.f32.mrb[137].mxu1  ;;  %v2448_v58 = vpop.f32.mrb[137].mxu0 }
 0x261   : > { %v3292_v53 = vadd.f32 %v3291_v45, %v3290_v32  ;;  %v2449_v16 = vadd.f32 %v2448_v58, %v2288_v34  ;;  %v3293_v24 = vpop.f32.mrb[138].mxu1  ;;  %v3369_v17 = vpop.f32.mrb[138].mxu0 }
 0x262   : > { %2505 = vst [vmem:[%s4518_s19 + $0xd0] sm:$0xff] %v2457_v44  ;;  %v2460_v41 = vadd.f32 %v3369_v17, %v2299_v15  ;;  %v3294_v55 = vpop.f32.mrb[139].mxu1  ;;  %v2451_v27 = vpop.f32.mrb[139].mxu0 }
 0x263   : > { %2503 = vst [vmem:[%s4518_s19 + $0xc0] sm:$0xff] %v2449_v16  ;;  %v3295_v20 = vadd.f32 %v3294_v55, %v3293_v24  ;;  %v2452_v31 = vadd.f32 %v2451_v27, %v2291_v59  ;;  %v2304_v42 = vadd.f32 %v3292_v53, %v4492_v51 }
 0x264   : > { %2506 = vst [vmem:[%s4518_s19 + $0xd8] sm:$0xff] %v2460_v41 }
 0x265   : > { %2504 = vst [vmem:[%s4518_s19 + $0xc8] sm:$0xff] %v2452_v31  ;;  %v2307_v29 = vadd.f32 %v3295_v20, %v4498_v7 }
 0x267   : > { %v3296_v37 = vpop.f32.mrb[140].mxu1  ;;  %v3372_v43 = vpop.f32.mrb[140].mxu0 }
 0x268   : > { %v3297_v47 = vpop.f32.mrb[141].mxu1  ;;  %v2464_v38 = vpop.f32.mrb[141].mxu0 }
 0x269   : > { %v3298_v22 = vadd.f32 %v3297_v47, %v3296_v37  ;;  %v2465_v9 = vadd.f32 %v2464_v38, %v2304_v42  ;;  %v3299_v56 = vpop.f32.mrb[142].mxu1  ;;  %v3373_v18 = vpop.f32.mrb[142].mxu0 }
 0x26a   : > { %v3300_v11 = vpop.f32.mrb[143].mxu1  ;;  %v2467_v51 = vpop.f32.mrb[143].mxu0 }
 0x26b   : > { %v2312_v60 = vadd.f32 %v3298_v22, %v4504_v5  ;;  %2507 = vst [vmem:[%s4518_s19 + $0xe0] sm:$0xff] %v2465_v9  ;;  %v3301_v7 = vadd.f32 %v3300_v11, %v3299_v56  ;;  %v2468_v62 = vadd.f32 %v2467_v51, %v2307_v29 }
 0x26d   : > { %v2473_v63 = vadd.f32 %v3372_v43, %v2312_v60  ;;  %v2315_v39 = vadd.f32 %v3301_v7, %v4511_v26  ;;  %2508 = vst [vmem:[%s4518_s19 + $0xe8] sm:$0xff] %v2468_v62 }
 0x26f   : > { %2509 = vst [vmem:[%s4518_s19 + $0xf0] sm:$0xff] %v2473_v63  ;;  %v2476_v5 = vadd.f32 %v3373_v18, %v2315_v39 }
 0x271   : > { %2510 = vst [vmem:[%s4518_s19 + $0xf8] sm:$0xff] %v2476_v5 }
 0x272   : > { %3823 = shalt.err (!%p3820_p5)
}
 0x273   : > { %s3824_s4 = scalar_lea.hbm %s4591_s6, 4096  ;;  %s3828_s15 = scalar_lea.hbm %s4646_s2, 8192 }
 0x274   : > { %p3825_p9 = scmp.ne.s32.totalorder %s4591_s6, %s3824_s4  ;;  %p3829_p3 = scmp.lt.u32.totalorder %s4591_s6, %s4646_s2 }
 0x275   : > { %p3830_p7 = scmp.lt.u32.totalorder %s3828_s15, %s3824_s4  ;;  %p3832_p4 = scmp.lt.u32.totalorder %s3824_s4, %s4591_s6 }
 0x276   : > { %p3826_p1 = pnand %p3825_p9, %p4014_p10 }
 0x277   : > { %p3831_p11 = por %p3830_p7, %p3829_p3 }
 0x278   : > { %p3827_p2 = pneg %p3826_p1 }
 0x279   : > { %p3833_p6 = por %p3832_p4, %p3831_p11 }
 0x27b   : > { %p3834_p8 = pnand %p3833_p6, %p3827_p2 }
 0x27d   : > { %3837 = shalt.err (!%p3834_p8)
}
 0x27e   : > { %s3905_s17 = smov 128   ;;  %s3906_s19 = smov 8  }
 0x27f   : > { %3399 = dma.vmem_to_hbm [thread:$0]  (%p4014_p10), %s4593_s30, 4096, %s4591_s6, %s2512_s27, %s3905_s17, %s3905_s17, %s3906_s19  }
 0x280 PF: > { %s2541_s21 = sand.u32 1, %s3876_s9   ;;  %p4663_p12 = scmp.ne.s32.totalorder %s4654_s20, 0 }
 0x281   : > { %p4664_p13 = scmp.ge.s32.totalorder %s3896_s14, 2  ;;  %s2542_s3 = scalar_lea.sflag [#allocation4], %s2541_s21 }
 0x283   : > { %p3410_p0 = pnand %p4664_p13, %p4663_p12 }
 0x285   : > { %3871 = dma.done.wait (!%p3410_p0), %s2542_s3, 4096  }
 0x286   : > { %3873 = vsyncadd (!%p3410_p0), %s2542_s3, 4294963200  ;;  %s19_s14 = sadd.s32 1, %s3896_s14   ;;  %s4665_s9 = smov %s3880_s10 }
 0x287   : > { %p16_p5 = scmp.ge.s32.totalorder %s19_s14, 4   ;;  %s4666_s10 = smov %s3884_s11 }
 0x288   : > { %s4667_s11 = smov %s4023_s28  ;;  %s4668_s12 = smov %s3892_s13 }
 0x289   : > { %s4669_s13 = smov %s4671_s25  ;;  %18 = sbr.rel (!%p16_p5) target bundleno = 7 (0x7), region = 78 }
 0x290   :  { %2547 = vsyncpa [#allocation3], 1 }
 0x291   :  { %2549 = vsyncpa [#allocation3 + $0x1], 1 }
 0x292   :  { %2550 = vsyncpa [#allocation6], 1 }
 0x293   :  { %2551 = vsyncpa [#allocation4], 1 }
 0x294   :  { %2553 = vsyncpa [#allocation4 + $0x1], 1 }

</bundles_post_ra>
